<compile_context>
chip_gen: v6e
topology: v6e:2x2x1
jax: 0.10.0
libtpu: 0.0.40
codegen_flags: <defaults>
</compile_context>

<pallas_src>
import functools

import jax
import jax.numpy as jnp
from jax import lax
from jax.experimental import pallas as pl
from jax.experimental.pallas import tpu as pltpu


def _round_up(x, m):
    return (x + m - 1) // m * m


# ----------------------------------------------------------------------------
# Pallas kernel 1: fused matmul  out = act((x @ w) * scale + shift)
# (used for the folded 4x4/stride-4 head conv and for the fc head)
# ----------------------------------------------------------------------------
def _fused_matmul_kernel(x_ref, w_ref, scale_ref, shift_ref, o_ref, *, apply_relu):
    acc = jnp.dot(x_ref[...], w_ref[...], preferred_element_type=jnp.float32)
    y = acc * scale_ref[...] + shift_ref[...]
    if apply_relu:
        y = jnp.maximum(y, 0.0)
    o_ref[...] = y.astype(o_ref.dtype)


def fused_matmul(x, w, scale, shift, *, apply_relu, out_dtype=jnp.float32,
                 tile_m=256):
    """x: (M, K); w: (K, N) bf16; scale/shift: (1, N) f32 -> (M, N) out_dtype."""
    M, K = x.shape
    K2, N = w.shape
    assert K == K2
    assert scale.shape == (1, N) and shift.shape == (1, N)

    tile_m = min(tile_m, _round_up(M, 8))
    Mp = _round_up(M, tile_m)
    x_p = x if x.dtype == jnp.bfloat16 else x.astype(jnp.bfloat16)
    if Mp != M:
        x_p = jnp.pad(x_p, ((0, Mp - M), (0, 0)))

    kernel = functools.partial(_fused_matmul_kernel, apply_relu=apply_relu)
    out = pl.pallas_call(
        kernel,
        out_shape=jax.ShapeDtypeStruct((Mp, N), out_dtype),
        grid=(Mp // tile_m,),
        in_specs=[
            pl.BlockSpec((tile_m, K), lambda i: (i, 0)),
            pl.BlockSpec((K, N), lambda i: (0, 0)),
            pl.BlockSpec((1, N), lambda i: (0, 0)),
            pl.BlockSpec((1, N), lambda i: (0, 0)),
        ],
        out_specs=pl.BlockSpec((tile_m, N), lambda i: (i, 0)),
        compiler_params=pltpu.CompilerParams(dimension_semantics=("parallel",)),
        cost_estimate=pl.CostEstimate(
            flops=2 * Mp * K * N,
            transcendentals=0,
            bytes_accessed=int(Mp * K * 2 + K * N * 2 + 2 * N * 4
                               + Mp * N * jnp.dtype(out_dtype).itemsize)),
    )(x_p, w, scale, shift)
    return out[:M] if Mp != M else out


# ----------------------------------------------------------------------------
# Pallas kernel 2: fused depth x (3x3 same-conv + bias -> embedding, BN+ReLU)
# Activation (with its zero halo) lives in a VMEM scratch across layers; grid
# is (batch parallel, layer sequential).
# ----------------------------------------------------------------------------
def _conv3x3_stack_kernel(x0_ref, w_ref, b_ref, s_ref, t_ref,
                          emb_ref, act_ref, xbuf, *, H, W, C):
    l = pl.program_id(1)
    last = pl.num_programs(1) - 1

    # Layer 0: zero the halo'd scratch and fill the interior with this batch
    # element's input activation (in-kernel padding; no XLA pad).
    @pl.when(l == 0)
    def _():
        xbuf[...] = jnp.zeros_like(xbuf)
        xbuf[1:1 + H, 1:1 + W, :] = x0_ref[0].astype(xbuf.dtype)

    M = H * W
    acc = jnp.zeros((M, C), jnp.float32)
    # 9-tap accumulation over shifted windows of the padded activation.
    # Weights are stored at their REAL (width x width) size -> no 16x
    # channel-padding inflation of the per-layer weight DMA.
    for di in range(3):
        for dj in range(3):
            lhs = xbuf[di:di + H, dj:dj + W, :].reshape(M, C).astype(jnp.bfloat16)
            rhs = w_ref[0, di * 3 + dj, :, :]                 # (C, C) bf16
            acc = acc + jnp.dot(lhs, rhs, preferred_element_type=jnp.float32)

    z = acc + b_ref[0]                                        # conv + bias = embedding
    emb_ref[0, 0] = z.astype(emb_ref.dtype)
    y = jnp.maximum(z * s_ref[0] + t_ref[0], 0.0)             # folded BN + ReLU

    @pl.when(l < last)                                        # feed the next layer only
    def _():
        xbuf[1:1 + H, 1:1 + W, :] = y.reshape(H, W, C).astype(xbuf.dtype)

    @pl.when(l == last)                                       # only the final act leaves
    def _():
        act_ref[0] = y.astype(act_ref.dtype)


def conv3x3_stack(x0, wstack, bstack, sstack, tstack, *, depth):
    """x0: (B, H, W, C) bf16 activation at real channel width.

    Returns (emb, act): emb (depth, B, H*W, C) f32 raw conv outputs (pre-BN),
    act (B, H*W, C) bf16 final activated output.
    """
    B, H, W, C = x0.shape
    M = H * W
    kernel = functools.partial(_conv3x3_stack_kernel, H=H, W=W, C=C)
    emb, act = pl.pallas_call(
        kernel,
        out_shape=(jax.ShapeDtypeStruct((depth, B, M, C), jnp.float32),
                   jax.ShapeDtypeStruct((B, M, C), jnp.bfloat16)),
        grid=(B, depth),
        in_specs=[
            pl.BlockSpec((1, H, W, C), lambda b, l: (b, 0, 0, 0)),
            pl.BlockSpec((1, 9, C, C), lambda b, l: (l, 0, 0, 0)),
            pl.BlockSpec((1, 1, C), lambda b, l: (l, 0, 0)),
            pl.BlockSpec((1, 1, C), lambda b, l: (l, 0, 0)),
            pl.BlockSpec((1, 1, C), lambda b, l: (l, 0, 0)),
        ],
        out_specs=(
            pl.BlockSpec((1, 1, M, C), lambda b, l: (l, b, 0, 0)),
            pl.BlockSpec((1, M, C), lambda b, l: (b, 0, 0)),  # resident across layers
        ),
        # TODO(synk): review suggests a bf16 xbuf; kept f32 because sublane-
        # offset masked stores into a packed-dtype scratch are a lowering risk
        # and this buffer is only ~13 KiB at real width.
        scratch_shapes=[pltpu.VMEM((H + 2, W + 2, C), jnp.float32)],
        compiler_params=pltpu.CompilerParams(
            dimension_semantics=("parallel", "arbitrary")),
        cost_estimate=pl.CostEstimate(
            flops=2 * depth * 9 * B * M * C * C,
            transcendentals=0,
            bytes_accessed=int(B * M * C * 2 + B * depth * 9 * C * C * 2
                               + 3 * depth * C * 4
                               + depth * B * M * C * 4 + B * M * C * 2)),
    )(x0, wstack, bstack, sstack, tstack)
    return emb, act


# ----------------------------------------------------------------------------
# Plain-JAX glue: space-to-depth im2col (kernel == stride -> no duplication)
# and BN folding helpers (all used outside the hot path where possible).
# ----------------------------------------------------------------------------
def im2col(x_nhwc, k, stride):
    B, H, W, C = x_nhwc.shape
    Ho = (H - k) // stride + 1
    Wo = (W - k) // stride + 1
    patches = []
    for i in range(k):
        for j in range(k):
            patches.append(
                x_nhwc[:, i:i + stride * Ho:stride, j:j + stride * Wo:stride, :])
    cols = jnp.concatenate(patches, axis=-1)          # (B, Ho, Wo, k*k*C)
    return cols.reshape(B * Ho * Wo, k * k * C), Ho, Wo


def bn_scale_shift(gamma, beta, mean, var, eps=1e-5):
    s = gamma / jnp.sqrt(var + eps)
    return s, beta - mean * s


def fold_conv_bias_bn(bias, gamma, beta, mean, var, eps=1e-5):
    s = gamma / jnp.sqrt(var + eps)
    return s, (bias - mean) * s + beta


# ----------------------------------------------------------------------------
# Parameter init (deterministic, synthetic) -- PyTorch-layout parameters.
# ----------------------------------------------------------------------------
def init_params(key, cin, width, depth, num_classes):
    p = {}
    ks = jax.random.split(key, 8 + 4 * depth)
    it = iter(ks)

    def bn(k):
        kg, kb, km, kv = jax.random.split(k, 4)
        return (1.0 + 0.1 * jax.random.normal(kg, (width,)),          # gamma
                0.1 * jax.random.normal(kb, (width,)),                 # beta
                0.1 * jax.random.normal(km, (width,)),                 # running_mean
                1.0 + 0.1 * jax.random.uniform(kv, (width,)))          # running_var

    p["conv1_w"] = 0.1 * jax.random.normal(next(it), (width, cin, 2, 2))
    p["conv1_b"] = 0.05 * jax.random.normal(next(it), (width,))
    p["bn1"] = bn(next(it))
    p["conv2_w"] = 0.1 * jax.random.normal(next(it), (width, width, 2, 2))
    p["conv2_b"] = 0.05 * jax.random.normal(next(it), (width,))
    p["bn2"] = bn(next(it))
    p["blocks"] = []
    for _ in range(depth):
        blk = {
            "w": 0.1 * jax.random.normal(next(it), (width, width, 3, 3)),
            "b": 0.05 * jax.random.normal(next(it), (width,)),
            "bn": bn(next(it)),
        }
        p["blocks"].append(blk)
    p["fc_w"] = 0.05 * jax.random.normal(next(it), (num_classes, width * 8 * 8))
    p["fc_b"] = 0.05 * jax.random.normal(next(it), (num_classes,))
    return jax.tree_util.tree_map(lambda a: jnp.asarray(a, jnp.float32), p)


# ----------------------------------------------------------------------------
# One-time parameter preparation (outside the hot path).
# ----------------------------------------------------------------------------
def prepare_params(params, *, width, depth, eps=1e-5):
    prep = {}

    # Head: fold conv1 (2x2/s2) + BN1 + conv2 (2x2/s2) into ONE 4x4/stride-4
    # conv (linear composition), then fold BN2 into the matmul epilogue.
    #   y1 = s1 * conv1_nobias(x) + c1
    #   W_eff[o, c, 2a+i, 2b+j] = sum_m W2[o,m,a,b] * s1[m] * W1[m,c,i,j]
    #   b_eff[o] = b2[o] + sum_{m,a,b} W2[o,m,a,b] * c1[m]
    w1 = params["conv1_w"]                                    # (W, cin, 2, 2)
    w2, b2 = params["conv2_w"], params["conv2_b"]             # (W, W, 2, 2)
    cin = w1.shape[1]
    s1, c1 = fold_conv_bias_bn(params["conv1_b"], *params["bn1"], eps=eps)
    w_eff = jnp.einsum("omab,m,mcij->ocaibj", w2, s1, w1).reshape(width, cin, 4, 4)
    b_eff = b2 + jnp.einsum("omab,m->o", w2, c1)
    s_head, t_head = fold_conv_bias_bn(b_eff, *params["bn2"], eps=eps)
    w_head = jnp.transpose(w_eff, (2, 3, 1, 0)).reshape(16 * cin, width)
    prep["head"] = (w_head.astype(jnp.bfloat16),
                    s_head.reshape(1, width).astype(jnp.float32),
                    t_head.reshape(1, width).astype(jnp.float32))

    # depth x (Conv 3x3 same + BN + ReLU): weights kept at REAL width.
    if depth > 0:
        ws, bs, ss, ts = [], [], [], []
        for blk in params["blocks"]:
            ws.append(jnp.transpose(blk["w"], (2, 3, 1, 0)).reshape(9, width, width))
            bs.append(blk["b"].reshape(1, width))
            s, t = bn_scale_shift(*blk["bn"], eps=eps)
            ss.append(s.reshape(1, width))
            ts.append(t.reshape(1, width))
        prep["blocks"] = (jnp.stack(ws).astype(jnp.bfloat16),   # (depth, 9, W, W)
                          jnp.stack(bs).astype(jnp.float32),
                          jnp.stack(ss).astype(jnp.float32),
                          jnp.stack(ts).astype(jnp.float32))

    # fc: Linear(width*8*8 -> nclass), weight rows re-ordered so the
    # activation flattens directly in (h, w, c) order at real width.
    nclass = params["fc_w"].shape[0]
    wf = params["fc_w"].reshape(nclass, width, 8, 8)           # (n, c, h, w)
    wf = jnp.transpose(wf, (2, 3, 1, 0)).reshape(8 * 8 * width, nclass)
    prep["fc"] = (wf.astype(jnp.bfloat16),
                  jnp.ones((1, nclass), jnp.float32),
                  params["fc_b"].reshape(1, nclass).astype(jnp.float32))
    return prep


# ----------------------------------------------------------------------------
# Forward pass
# ----------------------------------------------------------------------------
def convnet_forward(x_nchw, prep, *, width, depth, num_classes):
    B = x_nchw.shape[0]
    x = jnp.transpose(x_nchw, (0, 2, 3, 1))                    # NCHW -> NHWC

    # Head: folded (conv1 o BN1 o conv2) as one 4x4/s4 conv-as-matmul with
    # folded BN2 + ReLU.  4x4/s4 im2col is a pure space-to-depth reshape.
    cols, Ho, Wo = im2col(x, 4, 4)
    wh, sh, th = prep["head"]
    # tile_m=64 gives >=2 parallel grid steps so both v7x TensorCores get
    # work; the extra ~0.35us grid step is noise on single-TC v5e/v6e.
    y = fused_matmul(cols, wh, sh, th, apply_relu=True,
                     out_dtype=jnp.bfloat16, tile_m=64)         # (B*Ho*Wo, width) bf16

    embeddings = []
    if depth > 0:
        wstack, bstack, sstack, tstack = prep["blocks"]
        x0 = y.reshape(B, Ho, Wo, width)
        emb, act = conv3x3_stack(x0, wstack, bstack, sstack, tstack, depth=depth)
        # NCHW embeddings for parity with the PyTorch module (transpose is 4x
        # smaller than v2 since there are no padded lanes; keep NHWC if the
        # downstream consumer allows it).
        emb = emb.reshape(depth, B, Ho, Wo, width)
        emb = jnp.transpose(emb, (0, 1, 4, 2, 3))
        embeddings = [emb[i] for i in range(depth)]
        flat = act.reshape(B, Ho * Wo * width)                  # (h, w, c) order, bf16
    else:
        flat = y.reshape(B, Ho * Wo * width)

    # fc head (M == B, launch-overhead bound).
    # TODO(synk): fusing the fc into the stack's last grid step needs an
    # in-kernel (HW, C) -> (1, HW*C) relayout, a Mosaic reshape risk; left out.
    wf, sf, tf = prep["fc"]
    out = fused_matmul(flat, wf, sf, tf, apply_relu=False, tile_m=8)
    return out, embeddings


# ----------------------------------------------------------------------------
# Pure-JAX f32 reference (for the bf16-tolerance validation).
# ----------------------------------------------------------------------------
def convnet_reference(x, params, eps=1e-5):
    dn = ("NCHW", "OIHW", "NCHW")

    def bn(y, bnp):
        g, b, m, v = bnp
        inv = g / jnp.sqrt(v + eps)
        return y * inv[None, :, None, None] + (b - m * inv)[None, :, None, None]

    y = lax.conv_general_dilated(x, params["conv1_w"], (2, 2), "VALID",
                                 dimension_numbers=dn)
    y = bn(y + params["conv1_b"][None, :, None, None], params["bn1"])
    y = lax.conv_general_dilated(y, params["conv2_w"], (2, 2), "VALID",
                                 dimension_numbers=dn)
    y = jax.nn.relu(bn(y + params["conv2_b"][None, :, None, None], params["bn2"]))
    embs = []
    for blk in params["blocks"]:
        z = lax.conv_general_dilated(y, blk["w"], (1, 1), ((1, 1), (1, 1)),
                                     dimension_numbers=dn)
        z = z + blk["b"][None, :, None, None]
        embs.append(z)
        y = jax.nn.relu(bn(z, blk["bn"]))
    flat = y.reshape(y.shape[0], -1)
    return flat @ params["fc_w"].T + params["fc_b"], embs


# ----------------------------------------------------------------------------
if __name__ == "__main__":
    # fc expects width*8*8 features, which forces 32x32 spatial input after
    # the two stride-2 convs (folded here into one stride-4 conv).
    batch = 2
    num_input_channels = 4
    width = 32
    depth = 2
    num_output_classes = 10

    key = jax.random.PRNGKey(0)
    kx, kp = jax.random.split(key)
    x = jax.random.normal(kx, (batch, num_input_channels, 32, 32), jnp.float32)
    params = init_params(kp, num_input_channels, width, depth, num_output_classes)
    prep = prepare_params(params, width=width, depth=depth)

    fwd = jax.jit(functools.partial(convnet_forward, width=width, depth=depth,
                                    num_classes=num_output_classes))
    out, embeddings = fwd(x, prep)
    jax.block_until_ready(out)
    jax.block_until_ready(embeddings)

    assert out.shape == (batch, num_output_classes)
    assert len(embeddings) == depth
    assert all(e.shape == (batch, width, 8, 8) for e in embeddings)

    # Validate the bf16-MXU / f32-accumulation path against the f32 reference
    # (loose tolerance: three stacked bf16 matmul layers).
    ref_out, ref_embs = convnet_reference(x, params)

    def close(a, b, atol=1e-1, rtol=1e-1):
        return bool(jnp.all(jnp.abs(a - b) <= atol + rtol * jnp.abs(b)))

    assert close(out, ref_out), "fc output mismatch vs f32 reference"
    assert all(close(e, r) for e, r in zip(embeddings, ref_embs)), \
        "embedding mismatch vs f32 reference"
    print("KERNEL_OK")
</pallas_src>

<mosaic_0001>
module attributes {stable_mosaic.version = 11 : i64} {
  func.func @_fused_matmul_kernel(%arg0: i32, %arg1: memref<64x64xbf16, #tpu.memory_space<vmem>>, %arg2: memref<64x32xbf16, #tpu.memory_space<vmem>>, %arg3: memref<1x32xf32, #tpu.memory_space<vmem>>, %arg4: memref<1x32xf32, #tpu.memory_space<vmem>>, %arg5: memref<64x32xbf16, #tpu.memory_space<vmem>>) attributes {dimension_semantics = [#tpu.dimension_semantics<parallel>], iteration_bounds = array<i64: 2>, scalar_prefetch = 0 : i64, scratch_operands = 0 : i64, tpu.core_type = #tpu.core_type<tc>, window_params = [{transform_indices = @transform_0, window_bounds = array<i64: 64, 64>}, {pipeline_mode = #tpu.pipeline_mode<synchronous>, transform_indices = @transform_1, window_bounds = array<i64: 64, 32>}, {pipeline_mode = #tpu.pipeline_mode<synchronous>, transform_indices = @transform_2, window_bounds = array<i64: 1, 32>}, {pipeline_mode = #tpu.pipeline_mode<synchronous>, transform_indices = @transform_3, window_bounds = array<i64: 1, 32>}, {transform_indices = @transform_4, window_bounds = array<i64: 64, 32>}]} {
    %c0 = arith.constant 0 : index
    %c0_0 = arith.constant 0 : index
    %0 = vector.load %arg1[%c0, %c0_0] : memref<64x64xbf16, #tpu.memory_space<vmem>>, vector<64x64xbf16>
    %c0_1 = arith.constant 0 : index
    %c0_2 = arith.constant 0 : index
    %1 = vector.load %arg2[%c0_1, %c0_2] : memref<64x32xbf16, #tpu.memory_space<vmem>>, vector<64x32xbf16>
    %cst = arith.constant dense<0.000000e+00> : vector<64x32xf32>
    %2 = tpu.matmul %0, %1, %cst {dimension_numbers = #tpu.dot_dimension_numbers<[1], [0], [0], [1], [0, 0, 1, 1], [], []>} : vector<64x64xbf16>, vector<64x32xbf16>, vector<64x32xf32> -> vector<64x32xf32>
    %c0_3 = arith.constant 0 : index
    %c0_4 = arith.constant 0 : index
    %3 = vector.load %arg3[%c0_3, %c0_4] : memref<1x32xf32, #tpu.memory_space<vmem>>, vector<1x32xf32>
    %4 = vector.broadcast %3 : vector<1x32xf32> to vector<64x32xf32>
    %5 = arith.mulf %2, %4 : vector<64x32xf32>
    %c0_5 = arith.constant 0 : index
    %c0_6 = arith.constant 0 : index
    %6 = vector.load %arg4[%c0_5, %c0_6] : memref<1x32xf32, #tpu.memory_space<vmem>>, vector<1x32xf32>
    %7 = vector.broadcast %6 : vector<1x32xf32> to vector<64x32xf32>
    %8 = arith.addf %5, %7 : vector<64x32xf32>
    %cst_7 = arith.constant 0.000000e+00 : f32
    %9 = vector.broadcast %cst_7 : f32 to vector<64x32xf32>
    %10 = arith.maximumf %8, %9 : vector<64x32xf32>
    %11 = arith.truncf %10 : vector<64x32xf32> to vector<64x32xbf16>
    %c0_8 = arith.constant 0 : index
    %c0_9 = arith.constant 0 : index
    %12 = vector.load %arg5[%c0_8, %c0_9] : memref<64x32xbf16, #tpu.memory_space<vmem>>, vector<64x32xbf16>
    tpu.vector_store %arg5[%c0_8, %c0_9], %11 {strides = array<i32>} : memref<64x32xbf16, #tpu.memory_space<vmem>>, vector<64x32xbf16>,
    return
  }
  func.func @transform_0(%arg0: i32) -> (i32, i32) {
    %c0_i32 = arith.constant 0 : i32
    %c0_i32_0 = arith.constant 0 : i32
    return %arg0, %c0_i32 : i32, i32
  }
  func.func @transform_1(%arg0: i32) -> (i32, i32) {
    %c0_i32 = arith.constant 0 : i32
    %c0_i32_0 = arith.constant 0 : i32
    %c0_i32_1 = arith.constant 0 : i32
    return %c0_i32, %c0_i32_0 : i32, i32
  }
  func.func @transform_2(%arg0: i32) -> (i32, i32) {
    %c0_i32 = arith.constant 0 : i32
    %c0_i32_0 = arith.constant 0 : i32
    %c0_i32_1 = arith.constant 0 : i32
    return %c0_i32, %c0_i32_0 : i32, i32
  }
  func.func @transform_3(%arg0: i32) -> (i32, i32) {
    %c0_i32 = arith.constant 0 : i32
    %c0_i32_0 = arith.constant 0 : i32
    %c0_i32_1 = arith.constant 0 : i32
    return %c0_i32, %c0_i32_0 : i32, i32
  }
  func.func @transform_4(%arg0: i32) -> (i32, i32) {
    %c0_i32 = arith.constant 0 : i32
    %c0_i32_0 = arith.constant 0 : i32
    return %arg0, %c0_i32 : i32, i32
  }
}

module attributes {stable_mosaic.version = 11 : i64} {
  func.func @_conv3x3_stack_kernel(%arg0: i32, %arg1: i32, %arg2: memref<1x8x8x32xbf16, #tpu.memory_space<vmem>>, %arg3: memref<1x9x32x32xbf16, #tpu.memory_space<vmem>>, %arg4: memref<1x1x32xf32, #tpu.memory_space<vmem>>, %arg5: memref<1x1x32xf32, #tpu.memory_space<vmem>>, %arg6: memref<1x1x32xf32, #tpu.memory_space<vmem>>, %arg7: memref<1x1x64x32xf32, #tpu.memory_space<vmem>>, %arg8: memref<1x64x32xbf16, #tpu.memory_space<vmem>>, %arg9: memref<10x10x32xf32, #tpu.memory_space<vmem>>) attributes {dimension_semantics = [#tpu.dimension_semantics<parallel>, #tpu.dimension_semantics<arbitrary>], iteration_bounds = array<i64: 2, 2>, scalar_prefetch = 0 : i64, scratch_operands = 1 : i64, tpu.core_type = #tpu.core_type<tc>, window_params = [{transform_indices = @transform_0, window_bounds = array<i64: 1, 8, 8, 32>}, {transform_indices = @transform_1, window_bounds = array<i64: 1, 9, 32, 32>}, {transform_indices = @transform_2, window_bounds = array<i64: 1, 1, 32>}, {transform_indices = @transform_3, window_bounds = array<i64: 1, 1, 32>}, {transform_indices = @transform_4, window_bounds = array<i64: 1, 1, 32>}, {transform_indices = @transform_5, window_bounds = array<i64: 1, 1, 64, 32>}, {transform_indices = @transform_6, window_bounds = array<i64: 1, 64, 32>}]} {
    %c0_i32 = arith.constant 0 : i32
    %0 = arith.cmpi eq, %arg1, %c0_i32 : i32
    %1 = arith.extui %0 : i1 to i32
    %c0_i32_0 = arith.constant 0 : i32
    %2 = arith.cmpi ne, %1, %c0_i32_0 : i32
    scf.if %2 {
      %cst_81 = arith.constant 0.000000e+00 : f32
      %90 = vector.broadcast %cst_81 : f32 to vector<10x10x32xf32>
      %c0_82 = arith.constant 0 : index
      %c0_83 = arith.constant 0 : index
      %c0_84 = arith.constant 0 : index
      %91 = vector.load %arg9[%c0_82, %c0_83, %c0_84] : memref<10x10x32xf32, #tpu.memory_space<vmem>>, vector<10x10x32xf32>
      tpu.vector_store %arg9[%c0_82, %c0_83, %c0_84], %90 {strides = array<i32>} : memref<10x10x32xf32, #tpu.memory_space<vmem>>, vector<10x10x32xf32>,
      %c0_85 = arith.constant 0 : index
      %c0_86 = arith.constant 0 : index
      %c0_87 = arith.constant 0 : index
      %c0_88 = arith.constant 0 : index
      %92 = vector.load %arg2[%c0_85, %c0_86, %c0_87, %c0_88] : memref<1x8x8x32xbf16, #tpu.memory_space<vmem>>, vector<1x8x8x32xbf16>
      %93 = vector.shape_cast %92 : vector<1x8x8x32xbf16> to vector<8x8x32xbf16>
      %94 = arith.extf %93 : vector<8x8x32xbf16> to vector<8x8x32xf32>
      %c1_89 = arith.constant 1 : index
      %c1_90 = arith.constant 1 : index
      %c0_91 = arith.constant 0 : index
      %95 = vector.load %arg9[%c1_89, %c1_90, %c0_91] : memref<10x10x32xf32, #tpu.memory_space<vmem>>, vector<8x8x32xf32>
      tpu.vector_store %arg9[%c1_89, %c1_90, %c0_91], %94 {strides = array<i32>} : memref<10x10x32xf32, #tpu.memory_space<vmem>>, vector<8x8x32xf32>,
    } else {
    }
    %cst = arith.constant 0.000000e+00 : f32
    %3 = vector.broadcast %cst : f32 to vector<64x32xf32>
    %c0 = arith.constant 0 : index
    %c0_1 = arith.constant 0 : index
    %c0_2 = arith.constant 0 : index
    %4 = vector.load %arg9[%c0, %c0_1, %c0_2] : memref<10x10x32xf32, #tpu.memory_space<vmem>>, vector<8x8x32xf32>
    %5 = vector.shape_cast %4 : vector<8x8x32xf32> to vector<64x32xf32>
    %6 = arith.truncf %5 : vector<64x32xf32> to vector<64x32xbf16>
    %c0_3 = arith.constant 0 : index
    %c0_4 = arith.constant 0 : index
    %c0_5 = arith.constant 0 : index
    %c0_6 = arith.constant 0 : index
    %7 = vector.load %arg3[%c0_3, %c0_4, %c0_5, %c0_6] : memref<1x9x32x32xbf16, #tpu.memory_space<vmem>>, vector<1x1x32x32xbf16>
    %8 = vector.shape_cast %7 : vector<1x1x32x32xbf16> to vector<32x32xbf16>
    %cst_7 = arith.constant dense<0.000000e+00> : vector<64x32xf32>
    %9 = tpu.matmul %6, %8, %cst_7 {dimension_numbers = #tpu.dot_dimension_numbers<[1], [0], [0], [1], [0, 0, 1, 1], [], []>} : vector<64x32xbf16>, vector<32x32xbf16>, vector<64x32xf32> -> vector<64x32xf32>
    %10 = arith.addf %3, %9 : vector<64x32xf32>
    %c0_8 = arith.constant 0 : index
    %c1 = arith.constant 1 : index
    %c0_9 = arith.constant 0 : index
    %11 = vector.load %arg9[%c0_8, %c1, %c0_9] : memref<10x10x32xf32, #tpu.memory_space<vmem>>, vector<8x8x32xf32>
    %12 = vector.shape_cast %11 : vector<8x8x32xf32> to vector<64x32xf32>
    %13 = arith.truncf %12 : vector<64x32xf32> to vector<64x32xbf16>
    %c0_10 = arith.constant 0 : index
    %c1_11 = arith.constant 1 : index
    %c0_12 = arith.constant 0 : index
    %c0_13 = arith.constant 0 : index
    %14 = vector.load %arg3[%c0_10, %c1_11, %c0_12, %c0_13] : memref<1x9x32x32xbf16, #tpu.memory_space<vmem>>, vector<1x1x32x32xbf16>
    %15 = vector.shape_cast %14 : vector<1x1x32x32xbf16> to vector<32x32xbf16>
    %cst_14 = arith.constant dense<0.000000e+00> : vector<64x32xf32>
    %16 = tpu.matmul %13, %15, %cst_14 {dimension_numbers = #tpu.dot_dimension_numbers<[1], [0], [0], [1], [0, 0, 1, 1], [], []>} : vector<64x32xbf16>, vector<32x32xbf16>, vector<64x32xf32> -> vector<64x32xf32>
    %17 = arith.addf %10, %16 : vector<64x32xf32>
    %c0_15 = arith.constant 0 : index
    %c2 = arith.constant 2 : index
    %c0_16 = arith.constant 0 : index
    %18 = vector.load %arg9[%c0_15, %c2, %c0_16] : memref<10x10x32xf32, #tpu.memory_space<vmem>>, vector<8x8x32xf32>
    %19 = vector.shape_cast %18 : vector<8x8x32xf32> to vector<64x32xf32>
    %20 = arith.truncf %19 : vector<64x32xf32> to vector<64x32xbf16>
    %c0_17 = arith.constant 0 : index
    %c2_18 = arith.constant 2 : index
    %c0_19 = arith.constant 0 : index
    %c0_20 = arith.constant 0 : index
    %21 = vector.load %arg3[%c0_17, %c2_18, %c0_19, %c0_20] : memref<1x9x32x32xbf16, #tpu.memory_space<vmem>>, vector<1x1x32x32xbf16>
    %22 = vector.shape_cast %21 : vector<1x1x32x32xbf16> to vector<32x32xbf16>
    %cst_21 = arith.constant dense<0.000000e+00> : vector<64x32xf32>
    %23 = tpu.matmul %20, %22, %cst_21 {dimension_numbers = #tpu.dot_dimension_numbers<[1], [0], [0], [1], [0, 0, 1, 1], [], []>} : vector<64x32xbf16>, vector<32x32xbf16>, vector<64x32xf32> -> vector<64x32xf32>
    %24 = arith.addf %17, %23 : vector<64x32xf32>
    %c1_22 = arith.constant 1 : index
    %c0_23 = arith.constant 0 : index
    %c0_24 = arith.constant 0 : index
    %25 = vector.load %arg9[%c1_22, %c0_23, %c0_24] : memref<10x10x32xf32, #tpu.memory_space<vmem>>, vector<8x8x32xf32>
    %26 = vector.shape_cast %25 : vector<8x8x32xf32> to vector<64x32xf32>
    %27 = arith.truncf %26 : vector<64x32xf32> to vector<64x32xbf16>
    %c0_25 = arith.constant 0 : index
    %c3 = arith.constant 3 : index
    %c0_26 = arith.constant 0 : index
    %c0_27 = arith.constant 0 : index
    %28 = vector.load %arg3[%c0_25, %c3, %c0_26, %c0_27] : memref<1x9x32x32xbf16, #tpu.memory_space<vmem>>, vector<1x1x32x32xbf16>
    %29 = vector.shape_cast %28 : vector<1x1x32x32xbf16> to vector<32x32xbf16>
    %cst_28 = arith.constant dense<0.000000e+00> : vector<64x32xf32>
    %30 = tpu.matmul %27, %29, %cst_28 {dimension_numbers = #tpu.dot_dimension_numbers<[1], [0], [0], [1], [0, 0, 1, 1], [], []>} : vector<64x32xbf16>, vector<32x32xbf16>, vector<64x32xf32> -> vector<64x32xf32>
    %31 = arith.addf %24, %30 : vector<64x32xf32>
    %c1_29 = arith.constant 1 : index
    %c1_30 = arith.constant 1 : index
    %c0_31 = arith.constant 0 : index
    %32 = vector.load %arg9[%c1_29, %c1_30, %c0_31] : memref<10x10x32xf32, #tpu.memory_space<vmem>>, vector<8x8x32xf32>
    %33 = vector.shape_cast %32 : vector<8x8x32xf32> to vector<64x32xf32>
    %34 = arith.truncf %33 : vector<64x32xf32> to vector<64x32xbf16>
    %c0_32 = arith.constant 0 : index
    %c4 = arith.constant 4 : index
    %c0_33 = arith.constant 0 : index
    %c0_34 = arith.constant 0 : index
    %35 = vector.load %arg3[%c0_32, %c4, %c0_33, %c0_34] : memref<1x9x32x32xbf16, #tpu.memory_space<vmem>>, vector<1x1x32x32xbf16>
    %36 = vector.shape_cast %35 : vector<1x1x32x32xbf16> to vector<32x32xbf16>
    %cst_35 = arith.constant dense<0.000000e+00> : vector<64x32xf32>
    %37 = tpu.matmul %34, %36, %cst_35 {dimension_numbers = #tpu.dot_dimension_numbers<[1], [0], [0], [1], [0, 0, 1, 1], [], []>} : vector<64x32xbf16>, vector<32x32xbf16>, vector<64x32xf32> -> vector<64x32xf32>
    %38 = arith.addf %31, %37 : vector<64x32xf32>
    %c1_36 = arith.constant 1 : index
    %c2_37 = arith.constant 2 : index
    %c0_38 = arith.constant 0 : index
    %39 = vector.load %arg9[%c1_36, %c2_37, %c0_38] : memref<10x10x32xf32, #tpu.memory_space<vmem>>, vector<8x8x32xf32>
    %40 = vector.shape_cast %39 : vector<8x8x32xf32> to vector<64x32xf32>
    %41 = arith.truncf %40 : vector<64x32xf32> to vector<64x32xbf16>
    %c0_39 = arith.constant 0 : index
    %c5 = arith.constant 5 : index
    %c0_40 = arith.constant 0 : index
    %c0_41 = arith.constant 0 : index
    %42 = vector.load %arg3[%c0_39, %c5, %c0_40, %c0_41] : memref<1x9x32x32xbf16, #tpu.memory_space<vmem>>, vector<1x1x32x32xbf16>
    %43 = vector.shape_cast %42 : vector<1x1x32x32xbf16> to vector<32x32xbf16>
    %cst_42 = arith.constant dense<0.000000e+00> : vector<64x32xf32>
    %44 = tpu.matmul %41, %43, %cst_42 {dimension_numbers = #tpu.dot_dimension_numbers<[1], [0], [0], [1], [0, 0, 1, 1], [], []>} : vector<64x32xbf16>, vector<32x32xbf16>, vector<64x32xf32> -> vector<64x32xf32>
    %45 = arith.addf %38, %44 : vector<64x32xf32>
    %c2_43 = arith.constant 2 : index
    %c0_44 = arith.constant 0 : index
    %c0_45 = arith.constant 0 : index
    %46 = vector.load %arg9[%c2_43, %c0_44, %c0_45] : memref<10x10x32xf32, #tpu.memory_space<vmem>>, vector<8x8x32xf32>
    %47 = vector.shape_cast %46 : vector<8x8x32xf32> to vector<64x32xf32>
    %48 = arith.truncf %47 : vector<64x32xf32> to vector<64x32xbf16>
    %c0_46 = arith.constant 0 : index
    %c6 = arith.constant 6 : index
    %c0_47 = arith.constant 0 : index
    %c0_48 = arith.constant 0 : index
    %49 = vector.load %arg3[%c0_46, %c6, %c0_47, %c0_48] : memref<1x9x32x32xbf16, #tpu.memory_space<vmem>>, vector<1x1x32x32xbf16>
    %50 = vector.shape_cast %49 : vector<1x1x32x32xbf16> to vector<32x32xbf16>
    %cst_49 = arith.constant dense<0.000000e+00> : vector<64x32xf32>
    %51 = tpu.matmul %48, %50, %cst_49 {dimension_numbers = #tpu.dot_dimension_numbers<[1], [0], [0], [1], [0, 0, 1, 1], [], []>} : vector<64x32xbf16>, vector<32x32xbf16>, vector<64x32xf32> -> vector<64x32xf32>
    %52 = arith.addf %45, %51 : vector<64x32xf32>
    %c2_50 = arith.constant 2 : index
    %c1_51 = arith.constant 1 : index
    %c0_52 = arith.constant 0 : index
    %53 = vector.load %arg9[%c2_50, %c1_51, %c0_52] : memref<10x10x32xf32, #tpu.memory_space<vmem>>, vector<8x8x32xf32>
    %54 = vector.shape_cast %53 : vector<8x8x32xf32> to vector<64x32xf32>
    %55 = arith.truncf %54 : vector<64x32xf32> to vector<64x32xbf16>
    %c0_53 = arith.constant 0 : index
    %c7 = arith.constant 7 : index
    %c0_54 = arith.constant 0 : index
    %c0_55 = arith.constant 0 : index
    %56 = vector.load %arg3[%c0_53, %c7, %c0_54, %c0_55] : memref<1x9x32x32xbf16, #tpu.memory_space<vmem>>, vector<1x1x32x32xbf16>
    %57 = vector.shape_cast %56 : vector<1x1x32x32xbf16> to vector<32x32xbf16>
    %cst_56 = arith.constant dense<0.000000e+00> : vector<64x32xf32>
    %58 = tpu.matmul %55, %57, %cst_56 {dimension_numbers = #tpu.dot_dimension_numbers<[1], [0], [0], [1], [0, 0, 1, 1], [], []>} : vector<64x32xbf16>, vector<32x32xbf16>, vector<64x32xf32> -> vector<64x32xf32>
    %59 = arith.addf %52, %58 : vector<64x32xf32>
    %c2_57 = arith.constant 2 : index
    %c2_58 = arith.constant 2 : index
    %c0_59 = arith.constant 0 : index
    %60 = vector.load %arg9[%c2_57, %c2_58, %c0_59] : memref<10x10x32xf32, #tpu.memory_space<vmem>>, vector<8x8x32xf32>
    %61 = vector.shape_cast %60 : vector<8x8x32xf32> to vector<64x32xf32>
    %62 = arith.truncf %61 : vector<64x32xf32> to vector<64x32xbf16>
    %c0_60 = arith.constant 0 : index
    %c8 = arith.constant 8 : index
    %c0_61 = arith.constant 0 : index
    %c0_62 = arith.constant 0 : index
    %63 = vector.load %arg3[%c0_60, %c8, %c0_61, %c0_62] : memref<1x9x32x32xbf16, #tpu.memory_space<vmem>>, vector<1x1x32x32xbf16>
    %64 = vector.shape_cast %63 : vector<1x1x32x32xbf16> to vector<32x32xbf16>
    %cst_63 = arith.constant dense<0.000000e+00> : vector<64x32xf32>
    %65 = tpu.matmul %62, %64, %cst_63 {dimension_numbers = #tpu.dot_dimension_numbers<[1], [0], [0], [1], [0, 0, 1, 1], [], []>} : vector<64x32xbf16>, vector<32x32xbf16>, vector<64x32xf32> -> vector<64x32xf32>
    %66 = arith.addf %59, %65 : vector<64x32xf32>
    %c0_64 = arith.constant 0 : index
    %c0_65 = arith.constant 0 : index
    %c0_66 = arith.constant 0 : index
    %67 = vector.load %arg4[%c0_64, %c0_65, %c0_66] : memref<1x1x32xf32, #tpu.memory_space<vmem>>, vector<1x1x32xf32>
    %68 = vector.shape_cast %67 : vector<1x1x32xf32> to vector<1x32xf32>
    %69 = vector.broadcast %68 : vector<1x32xf32> to vector<64x32xf32>
    %70 = arith.addf %66, %69 : vector<64x32xf32>
    %c0_67 = arith.constant 0 : index
    %c0_68 = arith.constant 0 : index
    %c0_69 = arith.constant 0 : index
    %c0_70 = arith.constant 0 : index
    %71 = vector.load %arg7[%c0_67, %c0_68, %c0_69, %c0_70] : memref<1x1x64x32xf32, #tpu.memory_space<vmem>>, vector<1x1x64x32xf32>
    %72 = vector.shape_cast %71 : vector<1x1x64x32xf32> to vector<64x32xf32>
    %73 = vector.shape_cast %70 : vector<64x32xf32> to vector<1x1x64x32xf32>
    tpu.vector_store %arg7[%c0_67, %c0_68, %c0_69, %c0_70], %73 {strides = array<i32>} : memref<1x1x64x32xf32, #tpu.memory_space<vmem>>, vector<1x1x64x32xf32>,
    %c0_71 = arith.constant 0 : index
    %c0_72 = arith.constant 0 : index
    %c0_73 = arith.constant 0 : index
    %74 = vector.load %arg5[%c0_71, %c0_72, %c0_73] : memref<1x1x32xf32, #tpu.memory_space<vmem>>, vector<1x1x32xf32>
    %75 = vector.shape_cast %74 : vector<1x1x32xf32> to vector<1x32xf32>
    %76 = vector.broadcast %75 : vector<1x32xf32> to vector<64x32xf32>
    %77 = arith.mulf %70, %76 : vector<64x32xf32>
    %c0_74 = arith.constant 0 : index
    %c0_75 = arith.constant 0 : index
    %c0_76 = arith.constant 0 : index
    %78 = vector.load %arg6[%c0_74, %c0_75, %c0_76] : memref<1x1x32xf32, #tpu.memory_space<vmem>>, vector<1x1x32xf32>
    %79 = vector.shape_cast %78 : vector<1x1x32xf32> to vector<1x32xf32>
    %80 = vector.broadcast %79 : vector<1x32xf32> to vector<64x32xf32>
    %81 = arith.addf %77, %80 : vector<64x32xf32>
    %cst_77 = arith.constant 0.000000e+00 : f32
    %82 = vector.broadcast %cst_77 : f32 to vector<64x32xf32>
    %83 = arith.maximumf %81, %82 : vector<64x32xf32>
    %c1_i32 = arith.constant 1 : i32
    %84 = arith.cmpi slt, %arg1, %c1_i32 : i32
    %85 = arith.extui %84 : i1 to i32
    %c0_i32_78 = arith.constant 0 : i32
    %86 = arith.cmpi ne, %85, %c0_i32_78 : i32
    scf.if %86 {
      %90 = vector.shape_cast %83 : vector<64x32xf32> to vector<8x8x32xf32>
      %c1_81 = arith.constant 1 : index
      %c1_82 = arith.constant 1 : index
      %c0_83 = arith.constant 0 : index
      %91 = vector.load %arg9[%c1_81, %c1_82, %c0_83] : memref<10x10x32xf32, #tpu.memory_space<vmem>>, vector<8x8x32xf32>
      tpu.vector_store %arg9[%c1_81, %c1_82, %c0_83], %90 {strides = array<i32>} : memref<10x10x32xf32, #tpu.memory_space<vmem>>, vector<8x8x32xf32>,
    } else {
    }
    %c1_i32_79 = arith.constant 1 : i32
    %87 = arith.cmpi eq, %arg1, %c1_i32_79 : i32
    %88 = arith.extui %87 : i1 to i32
    %c0_i32_80 = arith.constant 0 : i32
    %89 = arith.cmpi ne, %88, %c0_i32_80 : i32
    scf.if %89 {
      %90 = arith.truncf %83 : vector<64x32xf32> to vector<64x32xbf16>
      %c0_81 = arith.constant 0 : index
      %c0_82 = arith.constant 0 : index
      %c0_83 = arith.constant 0 : index
      %91 = vector.load %arg8[%c0_81, %c0_82, %c0_83] : memref<1x64x32xbf16, #tpu.memory_space<vmem>>, vector<1x64x32xbf16>
      %92 = vector.shape_cast %91 : vector<1x64x32xbf16> to vector<64x32xbf16>
      %93 = vector.shape_cast %90 : vector<64x32xbf16> to vector<1x64x32xbf16>
      tpu.vector_store %arg8[%c0_81, %c0_82, %c0_83], %93 {strides = array<i32>} : memref<1x64x32xbf16, #tpu.memory_space<vmem>>, vector<1x64x32xbf16>,
    } else {
    }
    return
  }
  func.func @transform_0(%arg0: i32, %arg1: i32) -> (i32, i32, i32, i32) {
    %c0_i32 = arith.constant 0 : i32
    %c0_i32_0 = arith.constant 0 : i32
    %c0_i32_1 = arith.constant 0 : i32
    %c0_i32_2 = arith.constant 0 : i32
    return %arg0, %c0_i32, %c0_i32_0, %c0_i32_1 : i32, i32, i32, i32
  }
  func.func @transform_1(%arg0: i32, %arg1: i32) -> (i32, i32, i32, i32) {
    %c0_i32 = arith.constant 0 : i32
    %c0_i32_0 = arith.constant 0 : i32
    %c0_i32_1 = arith.constant 0 : i32
    %c0_i32_2 = arith.constant 0 : i32
    return %arg1, %c0_i32, %c0_i32_0, %c0_i32_1 : i32, i32, i32, i32
  }
  func.func @transform_2(%arg0: i32, %arg1: i32) -> (i32, i32, i32) {
    %c0_i32 = arith.constant 0 : i32
    %c0_i32_0 = arith.constant 0 : i32
    %c0_i32_1 = arith.constant 0 : i32
    return %arg1, %c0_i32, %c0_i32_0 : i32, i32, i32
  }
  func.func @transform_3(%arg0: i32, %arg1: i32) -> (i32, i32, i32) {
    %c0_i32 = arith.constant 0 : i32
    %c0_i32_0 = arith.constant 0 : i32
    %c0_i32_1 = arith.constant 0 : i32
    return %arg1, %c0_i32, %c0_i32_0 : i32, i32, i32
  }
  func.func @transform_4(%arg0: i32, %arg1: i32) -> (i32, i32, i32) {
    %c0_i32 = arith.constant 0 : i32
    %c0_i32_0 = arith.constant 0 : i32
    %c0_i32_1 = arith.constant 0 : i32
    return %arg1, %c0_i32, %c0_i32_0 : i32, i32, i32
  }
  func.func @transform_5(%arg0: i32, %arg1: i32) -> (i32, i32, i32, i32) {
    %c0_i32 = arith.constant 0 : i32
    %c0_i32_0 = arith.constant 0 : i32
    %c0_i32_1 = arith.constant 0 : i32
    return %arg1, %arg0, %c0_i32, %c0_i32_0 : i32, i32, i32, i32
  }
  func.func @transform_6(%arg0: i32, %arg1: i32) -> (i32, i32, i32) {
    %c0_i32 = arith.constant 0 : i32
    %c0_i32_0 = arith.constant 0 : i32
    %c0_i32_1 = arith.constant 0 : i32
    return %arg0, %c0_i32, %c0_i32_0 : i32, i32, i32
  }
}

module attributes {stable_mosaic.version = 11 : i64} {
  func.func @_fused_matmul_kernel(%arg0: i32, %arg1: memref<8x2048xbf16, #tpu.memory_space<vmem>>, %arg2: memref<2048x10xbf16, #tpu.memory_space<vmem>>, %arg3: memref<1x10xf32, #tpu.memory_space<vmem>>, %arg4: memref<1x10xf32, #tpu.memory_space<vmem>>, %arg5: memref<8x10xf32, #tpu.memory_space<vmem>>) attributes {dimension_semantics = [#tpu.dimension_semantics<parallel>], iteration_bounds = array<i64: 1>, scalar_prefetch = 0 : i64, scratch_operands = 0 : i64, tpu.core_type = #tpu.core_type<tc>, window_params = [{transform_indices = @transform_0, window_bounds = array<i64: 8, 2048>}, {pipeline_mode = #tpu.pipeline_mode<synchronous>, transform_indices = @transform_1, window_bounds = array<i64: 2048, 10>}, {pipeline_mode = #tpu.pipeline_mode<synchronous>, transform_indices = @transform_2, window_bounds = array<i64: 1, 10>}, {pipeline_mode = #tpu.pipeline_mode<synchronous>, transform_indices = @transform_3, window_bounds = array<i64: 1, 10>}, {transform_indices = @transform_4, window_bounds = array<i64: 8, 10>}]} {
    %c0 = arith.constant 0 : index
    %c0_0 = arith.constant 0 : index
    %0 = vector.load %arg1[%c0, %c0_0] : memref<8x2048xbf16, #tpu.memory_space<vmem>>, vector<8x2048xbf16>
    %c0_1 = arith.constant 0 : index
    %c0_2 = arith.constant 0 : index
    %1 = vector.load %arg2[%c0_1, %c0_2] : memref<2048x10xbf16, #tpu.memory_space<vmem>>, vector<2048x10xbf16>
    %cst = arith.constant dense<0.000000e+00> : vector<8x10xf32>
    %2 = tpu.matmul %0, %1, %cst {dimension_numbers = #tpu.dot_dimension_numbers<[1], [0], [0], [1], [0, 0, 1, 1], [], []>} : vector<8x2048xbf16>, vector<2048x10xbf16>, vector<8x10xf32> -> vector<8x10xf32>
    %c0_3 = arith.constant 0 : index
    %c0_4 = arith.constant 0 : index
    %3 = vector.load %arg3[%c0_3, %c0_4] : memref<1x10xf32, #tpu.memory_space<vmem>>, vector<1x10xf32>
    %4 = vector.broadcast %3 : vector<1x10xf32> to vector<8x10xf32>
    %5 = arith.mulf %2, %4 : vector<8x10xf32>
    %c0_5 = arith.constant 0 : index
    %c0_6 = arith.constant 0 : index
    %6 = vector.load %arg4[%c0_5, %c0_6] : memref<1x10xf32, #tpu.memory_space<vmem>>, vector<1x10xf32>
    %7 = vector.broadcast %6 : vector<1x10xf32> to vector<8x10xf32>
    %8 = arith.addf %5, %7 : vector<8x10xf32>
    %c0_7 = arith.constant 0 : index
    %c0_8 = arith.constant 0 : index
    %9 = vector.load %arg5[%c0_7, %c0_8] : memref<8x10xf32, #tpu.memory_space<vmem>>, vector<8x10xf32>
    tpu.vector_store %arg5[%c0_7, %c0_8], %8 {strides = array<i32>} : memref<8x10xf32, #tpu.memory_space<vmem>>, vector<8x10xf32>,
    return
  }
  func.func @transform_0(%arg0: i32) -> (i32, i32) {
    %c0_i32 = arith.constant 0 : i32
    %c0_i32_0 = arith.constant 0 : i32
    return %arg0, %c0_i32 : i32, i32
  }
  func.func @transform_1(%arg0: i32) -> (i32, i32) {
    %c0_i32 = arith.constant 0 : i32
    %c0_i32_0 = arith.constant 0 : i32
    %c0_i32_1 = arith.constant 0 : i32
    return %c0_i32, %c0_i32_0 : i32, i32
  }
  func.func @transform_2(%arg0: i32) -> (i32, i32) {
    %c0_i32 = arith.constant 0 : i32
    %c0_i32_0 = arith.constant 0 : i32
    %c0_i32_1 = arith.constant 0 : i32
    return %c0_i32, %c0_i32_0 : i32, i32
  }
  func.func @transform_3(%arg0: i32) -> (i32, i32) {
    %c0_i32 = arith.constant 0 : i32
    %c0_i32_0 = arith.constant 0 : i32
    %c0_i32_1 = arith.constant 0 : i32
    return %c0_i32, %c0_i32_0 : i32, i32
  }
  func.func @transform_4(%arg0: i32) -> (i32, i32) {
    %c0_i32 = arith.constant 0 : i32
    %c0_i32_0 = arith.constant 0 : i32
    return %arg0, %c0_i32 : i32, i32
  }
}

</mosaic_0001>

<bundles_post_ra>
// kernel: convnet_forward.3
= control target key start
LH: loop header
LB: loop body
LE: loop exit
PB: predicated region body
PF: predicated region fallthrough
CT: control target
= control target key end

     0   :  { %s597_s15 = smov 0   ;;  %s661_s0 = inlined_call_operand.vmem [shape: bf16[128,64], index: 0, kind: input, shape index: {}]   ;;  %s662_s1 = inlined_call_operand.vmem [shape: bf16[64,32], index: 1, kind: input, shape index: {}]   ;;  %s663_s2 = inlined_call_operand.vmem [shape: f32[1,32], index: 2, kind: input, shape index: {}]   ;;  %s664_s3 = inlined_call_operand.vmem [shape: f32[1,32], index: 3, kind: input, shape index: {}]   ;;  %s665_s4 = inlined_call_operand.vmem [shape: bf16[128,32], index: 4, kind: output, shape index: {}]  }
   0x1 LB: > { %s475_s16 = sadd.s32 4294967295, %s570_s15   ;;  %p479_p0 = scmp.ge.s32.totalorder %s570_s15, 1  ;;  %s570_s15 = sphi %s597_s15, %s14_s15  }
   0x2   : > { %p163_p1 = scmp.lt.s32.totalorder %s570_s15, 3 }
   0x4   : > { %p164_p2 = pnand %p479_p0, %p163_p1 }
   0x5   : > { %s480_s19 = sshll.u32 (!%p164_p2), %s475_s16, 3 }
   0x6   : > { %167 = sbr.rel (%p164_p2) target bundleno = 237 (0xed), region = 36  ;;  %p190_p3 = scmp.lt.s32.totalorder (!%p164_p2), %s480_s19, 15 }
   0xb   : > { %v556_v0 = vld [vmem:[%s662_s1 + $0x18] sm:$0xff]   ;;  %v557_v1 = vld [vmem:[%s662_s1 + $0x10] sm:$0xff]   ;;  %s667_s19 = smov (!%p190_p3, %s480_s19), 15  ;;  %v558_v2 = vld [vmem:[%s662_s1 + $0x8] sm:$0xff]   ;;  %vm262_vm0 = vcmask 523264   ;;  %vm410_vm1 = vcmask 257024  }
   0xc   : > { %524 = vmatprep.subr.bf16.mxu0 %v556_v0  ;;  %540 = vmatprep.subr.bf16.mxu1 %v556_v0  ;;  %s481_s24 = sshll.u32 %s667_s19, 2  ;;  %v559_v3 = vld [vmem:[%s662_s1] sm:$0xff]  }
   0xd   : > { %525 = vmatpush3.bf16.msra.mxu0 %v556_v0  ;;  %544 = vmatpush3.bf16.msra.mxu1 %v556_v0  ;;  %s193_s29 = scalar_lea.vmem %s661_s0, %s481_s24  ;;  %v496_v8 = vld [vmem:[%s663_s2] ss:$0 sm:$0xff]  ;;  %s640_s10 = scalar_lea.vmem %s665_s4, %s481_s24 }
   0xe   : > { %526 = vmatprep.subr.bf16.mxu0 %v557_v1  ;;  %541 = vmatprep.subr.bf16.mxu1 %v557_v1  ;;  %v560_v4 = vld [vmem:[%s193_s29] sm:$0xff]   ;;  %v561_v5 = vld [vmem:[%s193_s29 + $0x10] sm:$0xff]   ;;  %v562_v6 = vld [vmem:[%s193_s29 + $0x8] sm:$0xff]  }
   0xf   : > { %532 = vmatprep.mubr.msk.bf16.mxu0 %vm262_vm0, %v560_v4  ;;  %536 = vmatprep.mubr.msk.bf16.mxu1 %vm262_vm0, %v561_v5  ;;  %v563_v7 = vld [vmem:[%s193_s29 + $0x18] sm:$0xff]   ;;  %v497_v10 = vld [vmem:[%s664_s3] ss:$0 sm:$0xff] }
  0x11   : > { %527 = vmatpush3.bf16.msra.mxu0 %v557_v1  ;;  %545 = vmatpush3.bf16.msra.mxu1 %v557_v1 }
  0x12   : > { %528 = vmatprep.subr.bf16.mxu0 %v558_v2  ;;  %542 = vmatprep.subr.bf16.mxu1 %v558_v2 }
  0x15   : > { %529 = vmatpush3.bf16.msra.mxu0 %v558_v2  ;;  %546 = vmatpush3.bf16.msra.mxu1 %v558_v2 }
  0x16   : > { %530 = vmatprep.subr.bf16.mxu0 %v559_v3  ;;  %543 = vmatprep.subr.bf16.mxu1 %v559_v3 }
  0x19   : > { %531 = vmatpush3.bf16.msra.mxu0 %v559_v3  ;;  %547 = vmatpush3.bf16.msra.mxu1 %v559_v3 }
  0x1c   : > { %533 = vmatmul.mubr.msk.bf16.vlgmr.msra.gmra.mxu0 %vm262_vm0, %v562_v6  ;;  %537 = vmatmul.mubr.msk.bf16.vlgmr.msra.gmra.mxu1 %vm262_vm0, %v563_v7 }
  0xdc   : > { %v534_v9 = vpop.f32.mrf.mxu0  ;;  %v538_v11 = vpop.f32.mrf.mxu1 }
  0xdd   : > { %v349_v12 = vmul.f32 %v534_v9, %v496_v8  ;;  %v353_v13 = vmul.f32 %v538_v11, %v496_v8 }
  0xde   : > { %v309_v14 = vpop.f32.mrf.mxu0  ;;  %v325_v15 = vpop.f32.mrf.mxu1 }
  0xdf   : > { %v364_v16 = vadd.f32 %v497_v10, %v349_v12  ;;  %v368_v17 = vadd.f32 %v497_v10, %v353_v13  ;;  %v347_v18 = vmul.f32 %v496_v8, %v309_v14  ;;  %v351_v19 = vmul.f32 %v496_v8, %v325_v15 }
  0xe0   : > { %v535_v20 = vpop.f32.mrf.mxu0  ;;  %v539_v21 = vpop.f32.mrf.mxu1 }
  0xe1   : > { %v372_v22 = vmax.f32 %v364_v16, 0.0  ;;  %v376_v23 = vmax.f32 %v368_v17, 0.0  ;;  %v362_v24 = vadd.f32 %v497_v10, %v347_v18  ;;  %v366_v25 = vadd.f32 %v497_v10, %v351_v19 }
  0xe2   : > { %v350_v26 = vmul.f32 %v535_v20, %v496_v8  ;;  %v354_v27 = vmul.f32 %v539_v21, %v496_v8  ;;  %v312_v28 = vpop.f32.mrf.mxu0  ;;  %v328_v29 = vpop.f32.mrf.mxu1 }
  0xe3   : > { %v510_v30 = vpack.c.bf16 %v372_v22, %v372_v22  ;;  %v514_v31 = vpack.c.bf16 %v376_v23, %v376_v23  ;;  %v370_v32 = vmax.f32 %v362_v24, 0.0  ;;  %v374_v33 = vmax.f32 %v366_v25, 0.0 }
  0xe4   : > { %v365_v34 = vadd.f32 %v497_v10, %v350_v26  ;;  %v369_v35 = vadd.f32 %v497_v10, %v354_v27  ;;  %v348_v36 = vmul.f32 %v496_v8, %v312_v28  ;;  %v352_v37 = vmul.f32 %v496_v8, %v328_v29 }
  0xe5   : > { %413 = vst.msk [vmem:[%s640_s10 + $0x8] sm:$0xf] %vm410_vm1, %v510_v30  ;;  %417 = vst.msk [vmem:[%s640_s10 + $0x18] sm:$0xf] %vm410_vm1, %v514_v31  ;;  %v508_v38 = vpack.c.bf16 %v370_v32, %v370_v32  ;;  %v512_v39 = vpack.c.bf16 %v374_v33, %v374_v33 }
  0xe6   : > { %v373_v40 = vmax.f32 %v365_v34, 0.0  ;;  %v377_v41 = vmax.f32 %v369_v35, 0.0  ;;  %v363_v42 = vadd.f32 %v497_v10, %v348_v36  ;;  %v367_v43 = vadd.f32 %v497_v10, %v352_v37 }
  0xe7   : > { %411 = vst.msk [vmem:[%s640_s10] sm:$0xf] %vm410_vm1, %v508_v38  ;;  %415 = vst.msk [vmem:[%s640_s10 + $0x10] sm:$0xf] %vm410_vm1, %v512_v39 }
  0xe8   : > { %v511_v44 = vpack.c.bf16 %v373_v40, %v373_v40  ;;  %v515_v45 = vpack.c.bf16 %v377_v41, %v377_v41  ;;  %v371_v46 = vmax.f32 %v363_v42, 0.0  ;;  %v375_v47 = vmax.f32 %v367_v43, 0.0 }
  0xea   : > { %414 = vst.msk [vmem:[%s640_s10 + $0xc] sm:$0xf] %vm410_vm1, %v511_v44  ;;  %418 = vst.msk [vmem:[%s640_s10 + $0x1c] sm:$0xf] %vm410_vm1, %v515_v45  ;;  %v509_v48 = vpack.c.bf16 %v371_v46, %v371_v46  ;;  %v513_v49 = vpack.c.bf16 %v375_v47, %v375_v47 }
  0xec   : > { %412 = vst.msk [vmem:[%s640_s10 + $0x4] sm:$0xf] %vm410_vm1, %v509_v48  ;;  %416 = vst.msk [vmem:[%s640_s10 + $0x14] sm:$0xf] %vm410_vm1, %v513_v49 }
  0xed PF: > { %s14_s15 = sadd.s32 1, %s570_s15  }
  0xee   : > { %p11_p4 = scmp.ge.s32.totalorder %s14_s15, 4  }
  0xf0   :  { %13 = sbr.rel (!%p11_p4) target bundleno = 1 (0x1), region = 66 }

// kernel: convnet_forward.4
= control target key start
LH: loop header
LB: loop body
LE: loop exit
PB: predicated region body
PF: predicated region fallthrough
CT: control target
= control target key end

     0   :  { %s2135_s21 = smov 0   ;;  %s2137_s22 = smov 0   ;;  %s2490_s0 = inlined_call_operand.vmem [shape: bf16[2,8,8,32], index: 0, kind: input, shape index: {}]   ;;  %s2491_s1 = inlined_call_operand.vmem [shape: bf16[2,9,32,32], index: 1, kind: input, shape index: {}]   ;;  %s2492_s2 = inlined_call_operand.vmem [shape: f32[2,1,32], index: 2, kind: input, shape index: {}]   ;;  %s2493_s3 = inlined_call_operand.vmem [shape: f32[2,1,32], index: 3, kind: input, shape index: {}]   ;;  %s2494_s4 = inlined_call_operand.vmem [shape: f32[2,1,32], index: 4, kind: input, shape index: {}]   ;;  %s2495_s5 = inlined_call_operand.vmem [shape: f32[2,2,64,32], index: 5, kind: output, shape index: {0}]   ;;  %s2496_s6 = inlined_call_operand.vmem [shape: bf16[2,64,32], index: 6, kind: output, shape index: {1}]  }
   0x1   :  { %2497 = sst [smem:[#allocation5_spill]] %s2490_s0  ;;  %s2139_s23 = smov 0  }
   0x2   :  { %s2141_s24 = smov 0   ;;  %s2143_s25 = smov 0  }
   0x3 LB: > { %s26_s26 = sadd.s32 1, %s2089_s23  ;;  %s29_s27 = sadd.s32 1, %s2093_s24  ;;  %s2097_s25 = sphi %s2143_s25, %s17_s25   ;;  %s2093_s24 = sphi %s2141_s24, %s2507_s24   ;;  %s2089_s23 = sphi %s2139_s23, %s2506_s23   ;;  %s2085_s22 = sphi %s2137_s22, %s2505_s22   ;;  %s2081_s21 = sphi %s2135_s21, %s2504_s21  }
   0x4   : > { %p27_p0 = scmp.ge.s32.totalorder %s26_s26, 2  ;;  %p1693_p1 = scmp.ge.s32.totalorder %s2097_s25, 1 }
   0x5   : > { %p263_p2 = scmp.lt.s32.totalorder %s2097_s25, 5 }
   0x6   : > { %s2509_s26 = smov (%p27_p0, %s26_s26), 0  ;;  %s2511_s27 = smov (!%p27_p0, %s29_s27), %s2093_s24 }
   0x7   : > { %2498 = sst [smem:[#allocation3_spill]] %s2509_s26  ;;  %p264_p3 = pnand %p1693_p1, %p263_p2 }
   0x8   : > { %p31_p4 = scmp.ge.s32.totalorder %s2511_s27, 2  ;;  %p316_p5 = scmp.lt.s32.totalorder (!%p264_p3), %s2085_s22, 1 }
   0x9   : > { %267 = sbr.rel (%p264_p3) target bundleno = 342 (0x156), region = 40  ;;  %p321_p6 = scmp.lt.s32.totalorder (!%p264_p3), %s2081_s21, 1 }
   0xa   : > { %s2513_s27 = smov (%p31_p4, %s2511_s27), 0  ;;  %s2500_s0 = sld [smem:[#allocation5_spill]] (!%p264_p3) }
   0xb   : > { %2499 = sst [smem:[#allocation4_spill]] %s2513_s27  ;;  %p1702_p7 = scmp.ne.s32.totalorder (!%p264_p3), %s2081_s21, 0 }
   0xe   : > { %s2515_s22 = smov (!%p316_p5, %s2085_s22), 1 }
   0xf   : > { %s2169_s28 = scalar_select %p321_p6, %s2081_s21, 1 }
  0x10   : > { %s1804_s29 = sshll.u32 %s2515_s22, 5  ;;  %s1697_s30 = sshll.u32 %s2515_s22, 3 }
  0x11   : > { %s2174_s9 = scalar_lea.vmem %s2500_s0, %s1804_s29  ;;  %s1999_s10 = smul.u32 144, %s2169_s28 }
  0x12   : > { %s331_s16 = scalar_lea.vmem %s2493_s3, %s2169_s28  ;;  %s334_s7 = scalar_lea.vmem %s2494_s4, %s2169_s28 }
  0x13   : > { %s2188_s19 = scalar_lea.vmem %s2491_s1, %s1999_s10  ;;  %s1698_s8 = sshll.u32 %s2169_s28, 4 }
  0x14   : > { %s2198_s26 = scalar_lea.vmem %s2496_s6, %s1804_s29  ;;  %s341_s11 = sadd.s32 %s1698_s8, %s1697_s30 }
  0x15   : > { %s1699_s12 = sshll.u32 %s341_s11, 3  ;;  %353 = sbr.rel (%p1702_p7) target bundleno = 41 (0x29), region = 44 }
  0x16   : > { %s2203_s15 = scalar_lea.vmem %s2495_s5, %s1699_s12 }
  0x1a   : > { %vm354_vm0 = vcmask 261120   ;;  %vm356_vm1 = vcmask 254976   ;;  %v1815_v0 = vld [vmem:[%s2174_s9] sm:$0xff]   ;;  %v1830_v1 = vld [vmem:[%s2174_s9 + $0x8] sm:$0xff]   ;;  %v1831_v2 = vld [vmem:[%s2174_s9 + $0x10] sm:$0xff]   ;;  %v2099_v3 = vmov 0.0  }
  0x1b   : > { %358 = vst.msk [vmem:[#allocation2 + $0x10] sm:$0xff] %vm354_vm0, %v2099_v3  ;;  %355 = vst.msk [vmem:[#allocation2] sm:$0xff] %vm354_vm0, %v2099_v3  ;;  %v1816_v4 = vunpack.c.l.bf16 %v1815_v0  ;;  %v1817_v5 = vunpack.c.h.bf16 %v1815_v0  ;;  %v1820_v6 = vunpack.c.l.bf16 %v1830_v1  ;;  %v1821_v7 = vunpack.c.h.bf16 %v1830_v1  ;;  %v1832_v8 = vld [vmem:[%s2174_s9 + $0x18] sm:$0xff]  }
  0x1c   : > { %360 = vst.msk [vmem:[#allocation2 + $0x20] sm:$0xff] %vm354_vm0, %v2099_v3  ;;  %362 = vst.msk [vmem:[#allocation2 + $0x30] sm:$0xff] %vm354_vm0, %v2099_v3  ;;  %v1824_v9 = vunpack.c.l.bf16 %v1831_v2  ;;  %v1825_v10 = vunpack.c.h.bf16 %v1831_v2  ;;  %v1828_v11 = vunpack.c.l.bf16 %v1832_v8  ;;  %v1829_v12 = vunpack.c.h.bf16 %v1832_v8 }
  0x1d   : > { %364 = vst.msk [vmem:[#allocation2 + $0x40] sm:$0xff] %vm354_vm0, %v2099_v3  ;;  %366 = vst.msk [vmem:[#allocation2 + $0x50] sm:$0xff] %vm354_vm0, %v2099_v3 }
  0x1e   : > { %368 = vst.msk [vmem:[#allocation2 + $0x60] sm:$0xff] %vm354_vm0, %v2099_v3  ;;  %370 = vst.msk [vmem:[#allocation2 + $0x70] sm:$0xff] %vm354_vm0, %v2099_v3 }
  0x1f   : > { %372 = vst.msk [vmem:[#allocation2 + $0x80] sm:$0xff] %vm354_vm0, %v2099_v3  ;;  %374 = vst.msk [vmem:[#allocation2 + $0x90] sm:$0xff] %vm354_vm0, %v2099_v3 }
  0x20   : > { %359 = vst.msk [vmem:[#allocation2 + $0x18] sm:$0x3] %vm356_vm1, %v2099_v3  ;;  %357 = vst.msk [vmem:[#allocation2 + $0x8] sm:$0x3] %vm356_vm1, %v2099_v3 }
  0x21   : > { %361 = vst.msk [vmem:[#allocation2 + $0x28] sm:$0x3] %vm356_vm1, %v2099_v3  ;;  %363 = vst.msk [vmem:[#allocation2 + $0x38] sm:$0x3] %vm356_vm1, %v2099_v3 }
  0x22   : > { %365 = vst.msk [vmem:[#allocation2 + $0x48] sm:$0x3] %vm356_vm1, %v2099_v3  ;;  %367 = vst.msk [vmem:[#allocation2 + $0x58] sm:$0x3] %vm356_vm1, %v2099_v3 }
  0x23   : > { %369 = vst.msk [vmem:[#allocation2 + $0x68] sm:$0x3] %vm356_vm1, %v2099_v3  ;;  %371 = vst.msk [vmem:[#allocation2 + $0x78] sm:$0x3] %vm356_vm1, %v2099_v3 }
  0x24   : > { %373 = vst.msk [vmem:[#allocation2 + $0x88] sm:$0x3] %vm356_vm1, %v2099_v3  ;;  %375 = vst.msk [vmem:[#allocation2 + $0x98] sm:$0x3] %vm356_vm1, %v2099_v3 }
  0x25   : > { %393 = vst.msk [vmem:[#allocation2 + $0x11] sm:$0xff] %vm354_vm0, %v1816_v4  ;;  %394 = vst.msk [vmem:[#allocation2 + $0x21] sm:$0xff] %vm354_vm0, %v1817_v5 }
  0x26   : > { %395 = vst.msk [vmem:[#allocation2 + $0x31] sm:$0xff] %vm354_vm0, %v1820_v6  ;;  %396 = vst.msk [vmem:[#allocation2 + $0x41] sm:$0xff] %vm354_vm0, %v1821_v7 }
  0x27   : > { %397 = vst.msk [vmem:[#allocation2 + $0x51] sm:$0xff] %vm354_vm0, %v1824_v9  ;;  %398 = vst.msk [vmem:[#allocation2 + $0x61] sm:$0xff] %vm354_vm0, %v1825_v10 }
  0x28   : > { %399 = vst.msk [vmem:[#allocation2 + $0x71] sm:$0xff] %vm354_vm0, %v1828_v11  ;;  %400 = vst.msk [vmem:[#allocation2 + $0x81] sm:$0xff] %vm354_vm0, %v1829_v12 }
  0x29 PF: > { %v2041_v13 = vld [vmem:[%s2188_s19 + $0x18] sm:$0xff]   ;;  %v2042_v14 = vld [vmem:[%s2188_s19 + $0x10] sm:$0xff]   ;;  %v417_v15 = vld [vmem:[#allocation2 + $0x1] sm:$0xff]  ;;  %vm446_vm2 = vcmask 261120   ;;  %s2501_s29 = scalar_lea.vmem %s2492_s2, %s2169_s28  ;;  %p1792_p8 = scmp.ge.s32.totalorder %s2081_s21, 1 }
  0x2a   : > { %1887 = vmatprep.subr.bf16.mxu0 %v2041_v13  ;;  %1995 = vmatprep.subr.bf16.mxu1 %v2041_v13  ;;  %v2043_v25 = vld [vmem:[%s2188_s19 + $0x8] sm:$0xff]   ;;  %v2045_v29 = vld [vmem:[%s2188_s19] sm:$0xff]   ;;  %v2047_v41 = vld [vmem:[%s2188_s19 + $0x38] sm:$0xff]  }
  0x2b   : > { %1888 = vmatpush3.bf16.msra.mxu0 %v2041_v13  ;;  %1997 = vmatpush3.bf16.msra.mxu1 %v2041_v13  ;;  %v2044_v28 = vld [vmem:[%s2188_s19 + $0x28] sm:$0xff]   ;;  %v2046_v30 = vld [vmem:[%s2188_s19 + $0x20] sm:$0xff]   ;;  %v2049_v51 = vld [vmem:[%s2188_s19 + $0x30] sm:$0xff]  }
  0x2c   : > { %v2240_v16 = vld [vmem:[#allocation2 + $0x11] sm:$0xff]  ;;  %v2247_v20 = vld [vmem:[#allocation2 + $0x21] sm:$0xff]  ;;  %1889 = vmatprep.subr.bf16.mxu0 %v2042_v14  ;;  %1996 = vmatprep.subr.bf16.mxu1 %v2042_v14 }
  0x2d   : > { %v2242_v17 = vld [vmem:[#allocation2 + $0x41] sm:$0xff]  ;;  %v425_v18 = vpack.c.bf16 %v2240_v16, %v417_v15  ;;  %v2249_v21 = vld [vmem:[#allocation2 + $0x31] sm:$0xff]  ;;  %v850_v62 = vpack.c.bf16 %v2247_v20, %v2240_v16 }
  0x2e   : > { %v2245_v19 = vld [vmem:[#allocation2 + $0x51] sm:$0xff]  ;;  %v2255_v23 = vld [vmem:[#allocation2 + $0x61] sm:$0xff]  ;;  %v2265_v26 = vpack.c.bf16 %v2249_v21, %v2247_v20  ;;  %v851_v0 = vpack.c.bf16 %v2242_v17, %v2249_v21 }
  0x2f   : > { %v2253_v22 = vpack.c.bf16 %v2245_v19, %v2242_v17  ;;  %v2257_v24 = vld [vmem:[#allocation2 + $0x71] sm:$0xff]  ;;  %1891 = vmatprep.mubr.msk.bf16.mxu0 %vm446_vm2, %v425_v18  ;;  %1890 = vmatpush3.bf16.msra.mxu0 %v2042_v14  ;;  %v401_v31 = vld [vmem:[#allocation2] sm:$0xff]  ;;  %v2048_v42 = vld [vmem:[%s2188_s19 + $0x48] sm:$0xff]   ;;  %v852_v2 = vpack.c.bf16 %v2255_v23, %v2245_v19 }
  0x30   : > { %v2269_v27 = vpack.c.bf16 %v2257_v24, %v2255_v23  ;;  %1998 = vmatpush3.bf16.msra.mxu1 %v2042_v14  ;;  %1911 = vmatprep.subr.bf16.mxu0 %v2044_v28  ;;  %v402_v32 = vld [vmem:[#allocation2 + $0x10] sm:$0xff]  ;;  %v613_v33 = vld [vmem:[#allocation2 + $0x2] sm:$0xff]  ;;  %v2051_v57 = vld [vmem:[%s2188_s19 + $0x58] sm:$0xff]  }
  0x31   : > { %1895 = vmatprep.mubr.msk.bf16.mxu1 %vm446_vm2, %v2253_v22  ;;  %1899 = vmatprep.subr.bf16.mxu1 %v2043_v25  ;;  %v2274_v34 = vld [vmem:[#allocation2 + $0x12] sm:$0xff]  ;;  %v409_v35 = vpack.c.bf16 %v402_v32, %v401_v31  ;;  %v403_v37 = vld [vmem:[#allocation2 + $0x20] sm:$0xff]  ;;  %v2052_v58 = vld [vmem:[%s2188_s19 + $0x68] sm:$0xff]  }
  0x32   : > { %1892 = vmatmul.mubr.msk.bf16.vlgmr.msra.gmra.mxu0 %vm446_vm2, %v2265_v26  ;;  %v621_v36 = vpack.c.bf16 %v2274_v34, %v613_v33  ;;  %v404_v38 = vld [vmem:[#allocation2 + $0x30] sm:$0xff]  ;;  %v2281_v39 = vld [vmem:[#allocation2 + $0x22] sm:$0xff]  ;;  %v736_v61 = vpack.c.bf16 %v403_v37, %v402_v32  ;;  %v2055_v7 = vld [vmem:[%s2188_s19 + $0x78] sm:$0xff]  }
  0x33   : > { %1896 = vmatmul.mubr.msk.bf16.vlgmr.msra.gmra.mxu1 %vm446_vm2, %v2269_v27  ;;  %1912 = vmatpush3.bf16.msra.mxu0 %v2044_v28  ;;  %v2283_v40 = vld [vmem:[#allocation2 + $0x32] sm:$0xff]  ;;  %v405_v43 = vld [vmem:[#allocation2 + $0x40] sm:$0xff]  ;;  %v2289_v45 = vpack.c.bf16 %v404_v38, %v403_v37  ;;  %v2056_v8 = vld [vmem:[%s2188_s19 + $0x88] sm:$0xff]   ;;  %v964_v11 = vpack.c.bf16 %v2281_v39, %v2274_v34 }
  0x34   : > { %1900 = vmatpush3.bf16.msra.mxu1 %v2043_v25  ;;  %1913 = vmatprep.subr.bf16.mxu0 %v2046_v30  ;;  %v406_v44 = vld [vmem:[#allocation2 + $0x50] sm:$0xff]  ;;  %v2293_v46 = vpack.c.bf16 %v2283_v40, %v2281_v39  ;;  %v2295_v47 = vld [vmem:[#allocation2 + $0x42] sm:$0xff]  ;;  %v737_v63 = vpack.c.bf16 %v405_v43, %v404_v38 }
  0x35   : > { %1901 = vmatprep.subr.bf16.mxu1 %v2045_v29  ;;  %1903 = vmatprep.mubr.msk.bf16.mxu1 %vm446_vm2, %v409_v35  ;;  %v2297_v48 = vld [vmem:[#allocation2 + $0x52] sm:$0xff]  ;;  %v2299_v49 = vpack.c.bf16 %v406_v44, %v405_v43  ;;  %v407_v52 = vld [vmem:[#allocation2 + $0x60] sm:$0xff]  ;;  %v965_v12 = vpack.c.bf16 %v2295_v47, %v2283_v40 }
  0x36   : > { %1915 = vmatprep.mubr.msk.bf16.mxu0 %vm446_vm2, %v621_v36  ;;  %v2303_v50 = vpack.c.bf16 %v2297_v48, %v2295_v47  ;;  %v408_v53 = vld [vmem:[#allocation2 + $0x70] sm:$0xff]  ;;  %v2050_v54 = vld [vmem:[%s2188_s19 + $0x40] sm:$0xff]   ;;  %v738_v1 = vpack.c.bf16 %v407_v52, %v406_v44 }
  0x37   : > { %1914 = vmatpush3.bf16.msra.mxu0 %v2046_v30  ;;  %v619_v55 = vld [vmem:[#allocation2 + $0x62] sm:$0xff]  ;;  %v2311_v56 = vld [vmem:[#allocation2 + $0x72] sm:$0xff]  ;;  %v412_v59 = vpack.c.bf16 %v408_v53, %v407_v52 }
  0x38   : > { %1902 = vmatpush3.bf16.msra.mxu1 %v2045_v29  ;;  %1935 = vmatprep.subr.bf16.mxu0 %v2048_v42  ;;  %v2320_v60 = vpack.c.bf16 %v2311_v56, %v619_v55  ;;  %v2053_v3 = vld [vmem:[%s2188_s19 + $0x50] sm:$0xff]   ;;  %v2054_v4 = vld [vmem:[%s2188_s19 + $0x60] sm:$0xff]   ;;  %v966_v13 = vpack.c.bf16 %v619_v55, %v2297_v48 }
  0x39   : > { %1923 = vmatprep.subr.bf16.mxu1 %v2047_v41  ;;  %v735_v5 = vld [vmem:[#allocation2 + $0x80] sm:$0xff]  ;;  %v2057_v14 = vld [vmem:[%s2188_s19 + $0x70] sm:$0xff]  }
  0x3a   : > { %1916 = vmatmul.mubr.msk.bf16.vlgmr.msra.gmra.mxu0 %vm446_vm2, %v2293_v46  ;;  %v849_v6 = vld [vmem:[#allocation2 + $0x81] sm:$0xff]  ;;  %v739_v9 = vpack.c.bf16 %v735_v5, %v408_v53  ;;  %v1078_v17 = vld [vmem:[#allocation2 + $0x90] sm:$0xff] }
  0x3b   : > { %1904 = vmatmul.mubr.msk.bf16.vlgmr.msra.gmra.mxu1 %vm446_vm2, %v2289_v45  ;;  %1936 = vmatpush3.bf16.msra.mxu0 %v2048_v42  ;;  %v853_v10 = vpack.c.bf16 %v849_v6, %v2257_v24  ;;  %v2058_v15 = vld [vmem:[%s2188_s19 + $0x80] sm:$0xff]   ;;  %v1082_v19 = vpack.c.bf16 %v1078_v17, %v735_v5  ;;  %v1192_v20 = vld [vmem:[#allocation2 + $0x91] sm:$0xff] }
  0x3c   : > { %1924 = vmatpush3.bf16.msra.mxu1 %v2047_v41  ;;  %1907 = vmatprep.mubr.msk.bf16.mxu1 %vm446_vm2, %v2299_v49  ;;  %v963_v16 = vld [vmem:[#allocation2 + $0x82] sm:$0xff]  ;;  %v1306_v21 = vld [vmem:[#allocation2 + $0x92] sm:$0xff]  ;;  %v1196_v23 = vpack.c.bf16 %v1192_v20, %v849_v6 }
  0x3d   : > { %1919 = vmatprep.mubr.msk.bf16.mxu0 %vm446_vm2, %v2303_v50  ;;  %1925 = vmatprep.subr.bf16.mxu1 %v2049_v51  ;;  %v967_v18 = vpack.c.bf16 %v963_v16, %v2311_v56  ;;  %v1310_v24 = vpack.c.bf16 %v1306_v21, %v963_v16 }
  0x3e   : > { %1937 = vmatprep.subr.bf16.mxu0 %v2050_v54 }
  0x3f   : > { %1938 = vmatpush3.bf16.msra.mxu0 %v2050_v54 }
  0x40   : > { %1926 = vmatpush3.bf16.msra.mxu1 %v2049_v51  ;;  %1959 = vmatprep.subr.bf16.mxu0 %v2052_v58 }
  0x41   : > { %1947 = vmatprep.subr.bf16.mxu1 %v2051_v57 }
  0x42   : > { %1920 = vmatmul.mubr.msk.bf16.gmra.mxu0 %vm446_vm2, %v2320_v60 }
  0x43   : > { %1908 = vmatmul.mubr.msk.bf16.gmra.mxu1 %vm446_vm2, %v412_v59  ;;  %1939 = vmatprep.mubr.msk.bf16.mxu0 %vm446_vm2, %v850_v62 }
  0x44   : > { %1927 = vmatprep.mubr.msk.bf16.mxu1 %vm446_vm2, %v736_v61 }
  0x4a   : > { %1940 = vmatmul.mubr.msk.bf16.vlgmr.msra.gmra.mxu0 %vm446_vm2, %v851_v0 }
  0x4b   : > { %1928 = vmatmul.mubr.msk.bf16.vlgmr.msra.gmra.mxu1 %vm446_vm2, %v737_v63  ;;  %1960 = vmatpush3.bf16.msra.mxu0 %v2052_v58 }
  0x4c   : > { %1948 = vmatpush3.bf16.msra.mxu1 %v2051_v57  ;;  %1931 = vmatprep.mubr.msk.bf16.mxu1 %vm446_vm2, %v738_v1 }
  0x4d   : > { %1943 = vmatprep.mubr.msk.bf16.mxu0 %vm446_vm2, %v852_v2  ;;  %1949 = vmatprep.subr.bf16.mxu1 %v2053_v3 }
  0x4e   : > { %1961 = vmatprep.subr.bf16.mxu0 %v2054_v4 }
  0x4f   : > { %1962 = vmatpush3.bf16.msra.mxu0 %v2054_v4 }
  0x50   : > { %1950 = vmatpush3.bf16.msra.mxu1 %v2053_v3  ;;  %1983 = vmatprep.subr.bf16.mxu0 %v2056_v8 }
  0x51   : > { %1971 = vmatprep.subr.bf16.mxu1 %v2055_v7 }
  0x52   : > { %1944 = vmatmul.mubr.msk.bf16.gmra.mxu0 %vm446_vm2, %v853_v10 }
  0x53   : > { %1932 = vmatmul.mubr.msk.bf16.gmra.mxu1 %vm446_vm2, %v739_v9  ;;  %1963 = vmatprep.mubr.msk.bf16.mxu0 %vm446_vm2, %v2289_v45 }
  0x54   : > { %1951 = vmatprep.mubr.msk.bf16.mxu1 %vm446_vm2, %v964_v11 }
  0x5a   : > { %1964 = vmatmul.mubr.msk.bf16.vlgmr.msra.gmra.mxu0 %vm446_vm2, %v2299_v49 }
  0x5b   : > { %1952 = vmatmul.mubr.msk.bf16.vlgmr.msra.gmra.mxu1 %vm446_vm2, %v965_v12  ;;  %1984 = vmatpush3.bf16.msra.mxu0 %v2056_v8 }
  0x5c   : > { %1972 = vmatpush3.bf16.msra.mxu1 %v2055_v7  ;;  %1955 = vmatprep.mubr.msk.bf16.mxu1 %vm446_vm2, %v966_v13 }
  0x5d   : > { %1967 = vmatprep.mubr.msk.bf16.mxu0 %vm446_vm2, %v412_v59  ;;  %1973 = vmatprep.subr.bf16.mxu1 %v2057_v14 }
  0x5e   : > { %1985 = vmatprep.subr.bf16.mxu0 %v2058_v15 }
  0x5f   : > { %1986 = vmatpush3.bf16.msra.mxu0 %v2058_v15 }
  0x60   : > { %1974 = vmatpush3.bf16.msra.mxu1 %v2057_v14 }
  0x62   : > { %1968 = vmatmul.mubr.msk.bf16.gmra.mxu0 %vm446_vm2, %v1082_v19 }
  0x63   : > { %1956 = vmatmul.mubr.msk.bf16.gmra.mxu1 %vm446_vm2, %v967_v18  ;;  %1987 = vmatprep.mubr.msk.bf16.mxu0 %vm446_vm2, %v2293_v46 }
  0x64   : > { %1975 = vmatprep.mubr.msk.bf16.mxu1 %vm446_vm2, %v2265_v26 }
  0x6a   : > { %1988 = vmatmul.mubr.msk.bf16.vlgmr.msra.gmra.mxu0 %vm446_vm2, %v2303_v50 }
  0x6b   : > { %1976 = vmatmul.mubr.msk.bf16.vlgmr.msra.gmra.mxu1 %vm446_vm2, %v2253_v22  ;;  %1991 = vmatprep.mubr.msk.bf16.mxu0 %vm446_vm2, %v2320_v60 }
  0x6c   : > { %1979 = vmatprep.mubr.msk.bf16.mxu1 %vm446_vm2, %v2269_v27 }
  0x72   : > { %1992 = vmatmul.mubr.msk.bf16.gmra.mxu0 %vm446_vm2, %v1310_v24 }
  0x73   : > { %1980 = vmatmul.mubr.msk.bf16.gmra.mxu1 %vm446_vm2, %v1196_v23 }
  0xf2   : > { %v1893_v25 = vpop.f32.mrf.mxu0 }
  0xf3   : > { %v1897_v26 = vpop.f32.mrf.mxu1 }
  0xf4   : > { %v493_v22 = vpop.f32.mrf.mxu0 }
  0xf5   : > { %v509_v28 = vpop.f32.mrf.mxu1 }
  0xf6   : > { %v1894_v29 = vpop.f32.mrf.mxu0 }
  0xf7   : > { %v1898_v30 = vpop.f32.mrf.mxu1 }
  0xf8   : > { %v496_v31 = vpop.f32.mrf.mxu0 }
  0xf9   : > { %v2376_v32 = vpop.f32.mrf.mxu1 }
  0xfa   : > { %v1917_v33 = vpop.f32.mrf.mxu0 }
  0xfb   : > { %v1905_v27 = vpop.f32.mrf.mxu1 }
  0xfc   : > { %v688_v35 = vpop.f32.mrf.mxu0  ;;  %v591_v0 = vadd.f32 %v1905_v27, %v1893_v25 }
  0xfd   : > { %v582_v34 = vpop.f32.mrf.mxu1 }
  0xfe   : > { %v1918_v37 = vpop.f32.mrf.mxu0  ;;  %v583_v3 = vadd.f32 %v582_v34, %v493_v22  ;;  %v721_v6 = vadd.f32 %v1917_v33, %v591_v0 }
  0xff   : > { %v1906_v36 = vpop.f32.mrf.mxu1 }
 0x100   : > { %v691_v39 = vpop.f32.mrf.mxu0  ;;  %v594_v7 = vadd.f32 %v1906_v36, %v1894_v29  ;;  %v719_v10 = vadd.f32 %v688_v35, %v583_v3 }
 0x101   : > { %v585_v38 = vpop.f32.mrf.mxu1 }
 0x102   : > { %v1921_v41 = vpop.f32.mrf.mxu0  ;;  %v586_v11 = vadd.f32 %v585_v38, %v496_v31  ;;  %v722_v15 = vadd.f32 %v1918_v37, %v594_v7 }
 0x103   : > { %v1909_v40 = vpop.f32.mrf.mxu1 }
 0x104   : > { %v704_v43 = vpop.f32.mrf.mxu0  ;;  %v607_v17 = vadd.f32 %v1909_v40, %v1897_v26  ;;  %v720_v20 = vadd.f32 %v691_v39, %v586_v11 }
 0x105   : > { %v598_v42 = vpop.f32.mrf.mxu1 }
 0x106   : > { %v1922_v45 = vpop.f32.mrf.mxu0  ;;  %v599_v24 = vadd.f32 %v598_v42, %v509_v28  ;;  %v725_v31 = vadd.f32 %v1921_v41, %v607_v17 }
 0x107   : > { %v1910_v44 = vpop.f32.mrf.mxu1 }
 0x108   : > { %v707_v47 = vpop.f32.mrf.mxu0  ;;  %v610_v25 = vadd.f32 %v1910_v44, %v1898_v30  ;;  %v723_v40 = vadd.f32 %v704_v43, %v599_v24  ;;  %v2392_v43 = vld [vmem:[%s2501_s29] ss:$0 sm:$0xff] }
 0x109   : > { %v601_v46 = vpop.f32.mrf.mxu1 }
 0x10a   : > { %v1941_v49 = vpop.f32.mrf.mxu0  ;;  %v602_v35 = vadd.f32 %v601_v46, %v2376_v32 }
 0x10b   : > { %v1929_v48 = vpop.f32.mrf.mxu1 }
 0x10c   : > { %v917_v51 = vpop.f32.mrf.mxu0  ;;  %v836_v12 = vadd.f32 %v1929_v48, %v721_v6  ;;  %v726_v48 = vadd.f32 %v1922_v45, %v610_v25 }
 0x10d   : > { %v803_v50 = vpop.f32.mrf.mxu1 }
 0x10e   : > { %v1942_v53 = vpop.f32.mrf.mxu0  ;;  %v834_v16 = vadd.f32 %v803_v50, %v719_v10  ;;  %v950_v21 = vadd.f32 %v1941_v49, %v836_v12  ;;  %v724_v50 = vadd.f32 %v707_v47, %v602_v35 }
 0x10f   : > { %v1930_v52 = vpop.f32.mrf.mxu1 }
 0x110   : > { %v920_v55 = vpop.f32.mrf.mxu0  ;;  %v837_v23 = vadd.f32 %v1930_v52, %v722_v15  ;;  %v948_v29 = vadd.f32 %v917_v51, %v834_v16 }
 0x111   : > { %v806_v54 = vpop.f32.mrf.mxu1 }
 0x112   : > { %v1945_v57 = vpop.f32.mrf.mxu0  ;;  %v835_v33 = vadd.f32 %v806_v54, %v720_v20  ;;  %v951_v38 = vadd.f32 %v1942_v53, %v837_v23 }
 0x113   : > { %v1933_v56 = vpop.f32.mrf.mxu1 }
 0x114   : > { %v2378_v59 = vpop.f32.mrf.mxu0  ;;  %v840_v39 = vadd.f32 %v1933_v56, %v725_v31  ;;  %v949_v30 = vadd.f32 %v920_v55, %v835_v33 }
 0x115   : > { %v819_v58 = vpop.f32.mrf.mxu1 }
 0x116   : > { %v2380_v61 = vpop.f32.mrf.mxu0  ;;  %v838_v51 = vadd.f32 %v819_v58, %v723_v40  ;;  %v954_v53 = vadd.f32 %v1945_v57, %v840_v39  ;;  %v2401_v57 = vld [vmem:[%s331_s16] ss:$0 sm:$0xff] }
 0x117   : > { %v1934_v60 = vpop.f32.mrf.mxu1 }
 0x118   : > { %v2382_v63 = vpop.f32.mrf.mxu0  ;;  %v841_v52 = vadd.f32 %v1934_v60, %v726_v48  ;;  %v952_v60 = vadd.f32 %v2378_v59, %v838_v51 }
 0x119   : > { %v822_v62 = vpop.f32.mrf.mxu1 }
 0x11a   : > { %v1965_v2 = vpop.f32.mrf.mxu0 }
 0x11b   : > { %v1953_v1 = vpop.f32.mrf.mxu1 }
 0x11c   : > { %v1146_v5 = vpop.f32.mrf.mxu0  ;;  %v1064_v34 = vadd.f32 %v1953_v1, %v950_v21  ;;  %v839_v1 = vadd.f32 %v822_v62, %v724_v50 }
 0x11d   : > { %v1031_v4 = vpop.f32.mrf.mxu1 }
 0x11e   : > { %v1966_v9 = vpop.f32.mrf.mxu0  ;;  %v1062_v26 = vadd.f32 %v1031_v4, %v948_v29  ;;  %v1179_v42 = vadd.f32 %v1965_v2, %v1064_v34  ;;  %v955_v2 = vadd.f32 %v2380_v61, %v841_v52  ;;  %v2410_v61 = vld [vmem:[%s334_s7] ss:$0 sm:$0xff] }
 0x11f   : > { %v1954_v8 = vpop.f32.mrf.mxu1 }
 0x120   : > { %v1149_v14 = vpop.f32.mrf.mxu0  ;;  %v1065_v44 = vadd.f32 %v1954_v8, %v951_v38  ;;  %v1177_v32 = vadd.f32 %v1146_v5, %v1062_v26 }
 0x121   : > { %v1034_v13 = vpop.f32.mrf.mxu1 }
 0x122   : > { %v1969_v19 = vpop.f32.mrf.mxu0  ;;  %v1063_v46 = vadd.f32 %v1034_v13, %v949_v30  ;;  %v1180_v56 = vadd.f32 %v1966_v9, %v1065_v44  ;;  %v953_v9 = vadd.f32 %v2382_v63, %v839_v1 }
 0x123   : > { %v1957_v18 = vpop.f32.mrf.mxu1 }
 0x124   : > { %v2384_v27 = vpop.f32.mrf.mxu0  ;;  %v1068_v3 = vadd.f32 %v1957_v18, %v954_v53  ;;  %v1178_v5 = vadd.f32 %v1149_v14, %v1063_v46 }
 0x125   : > { %v1047_v22 = vpop.f32.mrf.mxu1 }
 0x126   : > { %v1970_v37 = vpop.f32.mrf.mxu0  ;;  %v1066_v59 = vadd.f32 %v1047_v22, %v952_v60  ;;  %v1183_v63 = vadd.f32 %v1969_v19, %v1068_v3 }
 0x127   : > { %v1958_v36 = vpop.f32.mrf.mxu1 }
 0x128   : > { %v1165_v28 = vpop.f32.mrf.mxu0  ;;  %v1069_v10 = vadd.f32 %v1958_v36, %v955_v2  ;;  %v1181_v22 = vadd.f32 %v2384_v27, %v1066_v59 }
 0x129   : > { %v1050_v49 = vpop.f32.mrf.mxu1 }
 0x12a   : > { %v1989_v41 = vpop.f32.mrf.mxu0  ;;  %v1067_v17 = vadd.f32 %v1050_v49, %v953_v9  ;;  %v1184_v29 = vadd.f32 %v1970_v37, %v1069_v10 }
 0x12b   : > { %v1977_v54 = vpop.f32.mrf.mxu1 }
 0x12c   : > { %v1293_v0 = vadd.f32 %v1977_v54, %v1179_v42  ;;  %v1374_v55 = vpop.f32.mrf.mxu0  ;;  %v1182_v26 = vadd.f32 %v1165_v28, %v1067_v17 }
 0x12d   : > { %v1260_v45 = vpop.f32.mrf.mxu1 }
 0x12e   : > { %v1407_v47 = vadd.f32 %v1989_v41, %v1293_v0  ;;  %v1291_v58 = vadd.f32 %v1260_v45, %v1177_v32  ;;  %v1990_v4 = vpop.f32.mrf.mxu0 }
 0x12f   : > { %v1978_v62 = vpop.f32.mrf.mxu1 }
 0x130   : > { %v1422_v6 = vadd.f32 %v2392_v43, %v1407_v47  ;;  %v1405_v7 = vadd.f32 %v1374_v55, %v1291_v58  ;;  %v1294_v8 = vadd.f32 %v1978_v62, %v1180_v56  ;;  %v1377_v12 = vpop.f32.mrf.mxu0 }
 0x131   : > { %v1263_v11 = vpop.f32.mrf.mxu1 }
 0x132   : > { %1430 = vst.msk [vmem:[%s2203_s15 + $0x10] sm:$0xff] %vm446_vm2, %v1422_v6  ;;  %v1445_v13 = vmul.f32 %v2401_v57, %v1422_v6  ;;  %v1420_v14 = vadd.f32 %v2392_v43, %v1405_v7  ;;  %v1408_v15 = vadd.f32 %v1990_v4, %v1294_v8  ;;  %v1292_v16 = vadd.f32 %v1263_v11, %v1178_v5  ;;  %v1993_v20 = vpop.f32.mrf.mxu0 }
 0x133   : > { %v1981_v18 = vpop.f32.mrf.mxu1 }
 0x134   : > { %v1460_v21 = vadd.f32 %v2410_v61, %v1445_v13  ;;  %1428 = vst.msk [vmem:[%s2203_s15] sm:$0xff] %vm446_vm2, %v1420_v14  ;;  %v1443_v23 = vmul.f32 %v2401_v57, %v1420_v14  ;;  %v1423_v24 = vadd.f32 %v2392_v43, %v1408_v15  ;;  %v1406_v25 = vadd.f32 %v1377_v12, %v1292_v16  ;;  %v1390_v19 = vpop.f32.mrf.mxu0 }
 0x135   : > { %v1297_v33 = vadd.f32 %v1981_v18, %v1183_v63  ;;  %v1276_v34 = vpop.f32.mrf.mxu1 }
 0x136   : > { %v2422_v31 = vmax.f32 %v1460_v21, 0.0  ;;  %v1458_v35 = vadd.f32 %v2410_v61, %v1443_v23  ;;  %1431 = vst.msk [vmem:[%s2203_s15 + $0x18] sm:$0xff] %vm446_vm2, %v1423_v24  ;;  %v1446_v36 = vmul.f32 %v2401_v57, %v1423_v24  ;;  %v1421_v38 = vadd.f32 %v2392_v43, %v1406_v25  ;;  %v1994_v37 = vpop.f32.mrf.mxu0 }
 0x137   : > { %v1411_v40 = vadd.f32 %v1993_v20, %v1297_v33  ;;  %v1295_v48 = vadd.f32 %v1276_v34, %v1181_v22  ;;  %v1982_v27 = vpop.f32.mrf.mxu1 }
 0x138   : > { %v1466_v39 = vmax.f32 %v1458_v35, 0.0  ;;  %v1461_v49 = vadd.f32 %v2410_v61, %v1446_v36  ;;  %1429 = vst.msk [vmem:[%s2203_s15 + $0x8] sm:$0xff] %vm446_vm2, %v1421_v38  ;;  %v1444_v30 = vmul.f32 %v2401_v57, %v1421_v38  ;;  %v1298_v42 = vadd.f32 %v1982_v27, %v1184_v29  ;;  %v1393_v0 = vpop.f32.mrf.mxu0 }
 0x139   : > { %v1426_v44 = vadd.f32 %v2392_v43, %v1411_v40  ;;  %v1409_v50 = vadd.f32 %v1390_v19, %v1295_v48  ;;  %v1279_v51 = vpop.f32.mrf.mxu1 }
 0x13a   : > { %v1469_v28 = vmax.f32 %v1461_v49, 0.0  ;;  %v1459_v52 = vadd.f32 %v2410_v61, %v1444_v30  ;;  %v1412_v54 = vadd.f32 %v1994_v37, %v1298_v42  ;;  %v1296_v41 = vadd.f32 %v1279_v51, %v1182_v26 }
 0x13b   : > { %1434 = vst.msk [vmem:[%s2203_s15 + $0x30] sm:$0xff] %vm446_vm2, %v1426_v44  ;;  %v1449_v32 = vmul.f32 %v2401_v57, %v1426_v44  ;;  %v1424_v46 = vadd.f32 %v2392_v43, %v1409_v50 }
 0x13c   : > { %v1467_v53 = vmax.f32 %v1459_v52, 0.0  ;;  %v1427_v1 = vadd.f32 %v2392_v43, %v1412_v54  ;;  %v1410_v45 = vadd.f32 %v1393_v0, %v1296_v41 }
 0x13d   : > { %v1464_v55 = vadd.f32 %v2410_v61, %v1449_v32  ;;  %1432 = vst.msk [vmem:[%s2203_s15 + $0x20] sm:$0xff] %vm446_vm2, %v1424_v46  ;;  %v1447_v56 = vmul.f32 %v2401_v57, %v1424_v46 }
 0x13e   : > { %1435 = vst.msk [vmem:[%s2203_s15 + $0x38] sm:$0xff] %vm446_vm2, %v1427_v1  ;;  %v1450_v47 = vmul.f32 %v2401_v57, %v1427_v1  ;;  %v1425_v58 = vadd.f32 %v2392_v43, %v1410_v45 }
 0x13f   : > { %v1472_v60 = vmax.f32 %v1464_v55, 0.0  ;;  %v1462_v2 = vadd.f32 %v2410_v61, %v1447_v56 }
 0x140   : > { %v1465_v3 = vadd.f32 %v2410_v61, %v1450_v47  ;;  %1433 = vst.msk [vmem:[%s2203_s15 + $0x28] sm:$0xff] %vm446_vm2, %v1425_v58  ;;  %v1448_v62 = vmul.f32 %v2401_v57, %v1425_v58  ;;  %1477 = sbr.rel (%p1792_p8) target bundleno = 329 (0x149), region = 48 }
 0x141   : > { %v1470_v4 = vmax.f32 %v1462_v2, 0.0 }
 0x142   : > { %v1473_v5 = vmax.f32 %v1465_v3, 0.0  ;;  %v1463_v6 = vadd.f32 %v2410_v61, %v1448_v62 }
 0x144   : > { %v1471_v7 = vmax.f32 %v1463_v6, 0.0 }
 0x145   : > { %1478 = vst.msk [vmem:[#allocation2 + $0x11] sm:$0xff] %vm446_vm2, %v1466_v39  ;;  %1479 = vst.msk [vmem:[#allocation2 + $0x21] sm:$0xff] %vm446_vm2, %v1467_v53 }
 0x146   : > { %1480 = vst.msk [vmem:[#allocation2 + $0x31] sm:$0xff] %vm446_vm2, %v2422_v31  ;;  %1481 = vst.msk [vmem:[#allocation2 + $0x41] sm:$0xff] %vm446_vm2, %v1469_v28 }
 0x147   : > { %1482 = vst.msk [vmem:[#allocation2 + $0x51] sm:$0xff] %vm446_vm2, %v1470_v4  ;;  %1483 = vst.msk [vmem:[#allocation2 + $0x61] sm:$0xff] %vm446_vm2, %v1471_v7 }
 0x148   : > { %1484 = vst.msk [vmem:[#allocation2 + $0x71] sm:$0xff] %vm446_vm2, %v1472_v60  ;;  %1485 = vst.msk [vmem:[#allocation2 + $0x81] sm:$0xff] %vm446_vm2, %v1473_v5 }
 0x149 PF: > { %p1793_p9 = scmp.ne.s32.totalorder %s2081_s21, 1 }
 0x14b   : > { %1489 = sbr.rel (%p1793_p9) target bundleno = 342 (0x156), region = 52 }
 0x150   : > { %v1806_v43 = vpack.c.bf16 %v1466_v39, %v1466_v39  ;;  %vm1522_vm3 = vcmask 257024   ;;  %v1807_v57 = vpack.c.bf16 %v1467_v53, %v1467_v53  ;;  %v1808_v8 = vpack.c.bf16 %v2422_v31, %v2422_v31 }
 0x151   : > { %v1809_v9 = vpack.c.bf16 %v1469_v28, %v1469_v28  ;;  %v1810_v59 = vpack.c.bf16 %v1470_v4, %v1470_v4  ;;  %v1811_v10 = vpack.c.bf16 %v1471_v7, %v1471_v7  ;;  %v1812_v61 = vpack.c.bf16 %v1472_v60, %v1472_v60 }
 0x152   : > { %1523 = vst.msk [vmem:[%s2198_s26] sm:$0xf] %vm1522_vm3, %v1806_v43  ;;  %1524 = vst.msk [vmem:[%s2198_s26 + $0x4] sm:$0xf] %vm1522_vm3, %v1807_v57  ;;  %v1813_v11 = vpack.c.bf16 %v1473_v5, %v1473_v5 }
 0x153   : > { %1525 = vst.msk [vmem:[%s2198_s26 + $0x8] sm:$0xf] %vm1522_vm3, %v1808_v8  ;;  %1526 = vst.msk [vmem:[%s2198_s26 + $0xc] sm:$0xf] %vm1522_vm3, %v1809_v9 }
 0x154   : > { %1527 = vst.msk [vmem:[%s2198_s26 + $0x10] sm:$0xf] %vm1522_vm3, %v1810_v59  ;;  %1528 = vst.msk [vmem:[%s2198_s26 + $0x14] sm:$0xf] %vm1522_vm3, %v1811_v10 }
 0x155   : > { %1529 = vst.msk [vmem:[%s2198_s26 + $0x18] sm:$0xf] %vm1522_vm3, %v1812_v61  ;;  %1530 = vst.msk [vmem:[%s2198_s26 + $0x1c] sm:$0xf] %vm1522_vm3, %v1813_v11 }
 0x156 PF: > { %s17_s25 = sadd.s32 1, %s2097_s25   ;;  %s2502_s28 = sld [smem:[#allocation3_spill]] }
 0x157   : > { %p14_p10 = scmp.ge.s32.totalorder %s17_s25, 6   ;;  %s2503_s16 = sld [smem:[#allocation4_spill]] }
 0x158   : > { %s2504_s21 = smov %s2089_s23  ;;  %s2505_s22 = smov %s2093_s24 }
 0x159   :  { %16 = sbr.rel (!%p14_p10) target bundleno = 3 (0x3), region = 117 }
 0x15c   : > { %s2506_s23 = smov %s2502_s28 }
 0x15d   : > { %s2507_s24 = smov %s2503_s16 }

// kernel: convnet_forward.5
= control target key start
LH: loop header
LB: loop body
LE: loop exit
PB: predicated region body
PF: predicated region fallthrough
CT: control target
= control target key end

     0   :  { %vm1442_vm0 = vcmask 80896   ;;  %s2356_s1 = inlined_call_operand.vmem [shape: bf16[2048,10], index: 1, kind: input, shape index: {}]   ;;  %s2357_s0 = inlined_call_operand.vmem [shape: bf16[8,2048], index: 0, kind: input, shape index: {}]   ;;  %s2358_s2 = inlined_call_operand.vmem [shape: f32[1,10], index: 2, kind: input, shape index: {}]   ;;  %s2359_s3 = inlined_call_operand.vmem [shape: f32[1,10], index: 3, kind: input, shape index: {}]   ;;  %s2360_s4 = inlined_call_operand.vmem [shape: f32[8,10], index: 4, kind: output, shape index: {}]  }
   0x1   :  { %v1770_v0 = vld [vmem:[%s2356_s1 + $0x78] sm:$0xff]   ;;  %v1774_v4 = vld [vmem:[%s2356_s1 + $0x70] sm:$0xff]   ;;  %v1778_v8 = vld [vmem:[%s2356_s1 + $0x68] sm:$0xff]  }
   0x2   :  { %v1771_v1 = vld [vmem:[%s2356_s1 + $0xf8] sm:$0xff]   ;;  %1594 = vmatprep.subr.bf16.mxu0 %v1770_v0  ;;  %v1775_v5 = vld [vmem:[%s2356_s1 + $0xf0] sm:$0xff]   ;;  %v1779_v9 = vld [vmem:[%s2356_s1 + $0xe8] sm:$0xff]  }
   0x3   :  { %v1772_v2 = vld [vmem:[%s2356_s1 + $0x38] sm:$0xff]   ;;  %1616 = vmatprep.subr.bf16.mxu1 %v1771_v1  ;;  %v1776_v6 = vld [vmem:[%s2356_s1 + $0x30] sm:$0xff]   ;;  %v1780_v10 = vld [vmem:[%s2356_s1 + $0x28] sm:$0xff]  }
   0x4   :  { %v1773_v3 = vld [vmem:[%s2356_s1 + $0xb8] sm:$0xff]   ;;  %1595 = vmatpush3.bf16.msra.mxu0 %v1772_v2  ;;  %v1777_v7 = vld [vmem:[%s2356_s1 + $0xb0] sm:$0xff]   ;;  %v1781_v11 = vld [vmem:[%s2356_s1 + $0xa8] sm:$0xff]  }
   0x5   :  { %1617 = vmatpush3.bf16.msra.mxu1 %v1773_v3  ;;  %1596 = vmatprep.subr.bf16.mxu0 %v1774_v4  ;;  %v1782_v12 = vld [vmem:[%s2356_s1 + $0x60] sm:$0xff]   ;;  %v1786_v16 = vld [vmem:[%s2356_s1 + $0x58] sm:$0xff]   ;;  %v1790_v20 = vld [vmem:[%s2356_s1 + $0x50] sm:$0xff]  }
   0x6   :  { %1618 = vmatprep.subr.bf16.mxu1 %v1775_v5  ;;  %v1783_v13 = vld [vmem:[%s2356_s1 + $0xe0] sm:$0xff]   ;;  %v1787_v17 = vld [vmem:[%s2356_s1 + $0xd8] sm:$0xff]   ;;  %v1791_v21 = vld [vmem:[%s2356_s1 + $0xd0] sm:$0xff]  }
   0x7   :  { %v1784_v14 = vld [vmem:[%s2356_s1 + $0x20] sm:$0xff]   ;;  %v1788_v18 = vld [vmem:[%s2356_s1 + $0x18] sm:$0xff]   ;;  %v1792_v22 = vld [vmem:[%s2356_s1 + $0x10] sm:$0xff]  }
   0x8   :  { %1597 = vmatpush3.bf16.msra.mxu0 %v1776_v6  ;;  %v1785_v15 = vld [vmem:[%s2356_s1 + $0xa0] sm:$0xff]   ;;  %v1789_v19 = vld [vmem:[%s2356_s1 + $0x98] sm:$0xff]   ;;  %v1793_v23 = vld [vmem:[%s2356_s1 + $0x90] sm:$0xff]  }
   0x9   :  { %1619 = vmatpush3.bf16.msra.mxu1 %v1777_v7  ;;  %1598 = vmatprep.subr.bf16.mxu0 %v1778_v8  ;;  %v1794_v24 = vld [vmem:[%s2356_s1 + $0x48] sm:$0xff]   ;;  %v1798_v28 = vld [vmem:[%s2356_s1 + $0x40] sm:$0xff]   ;;  %v1806_v38 = vld [vmem:[%s2356_s1 + $0x178] sm:$0xff]  }
   0xa   :  { %1620 = vmatprep.subr.bf16.mxu1 %v1779_v9  ;;  %v1795_v25 = vld [vmem:[%s2356_s1 + $0xc8] sm:$0xff]   ;;  %v1799_v29 = vld [vmem:[%s2356_s1 + $0xc0] sm:$0xff]   ;;  %v1807_v39 = vld [vmem:[%s2356_s1 + $0x1f8] sm:$0xff]  }
   0xb   :  { %v1796_v26 = vld [vmem:[%s2356_s1 + $0x8] sm:$0xff]   ;;  %v1800_v30 = vld [vmem:[%s2356_s1] sm:$0xff]   ;;  %v1808_v40 = vld [vmem:[%s2356_s1 + $0x138] sm:$0xff]  }
   0xc   :  { %1599 = vmatpush3.bf16.msra.mxu0 %v1780_v10  ;;  %v1797_v27 = vld [vmem:[%s2356_s1 + $0x88] sm:$0xff]   ;;  %v1801_v31 = vld [vmem:[%s2356_s1 + $0x80] sm:$0xff]   ;;  %v1809_v41 = vld [vmem:[%s2356_s1 + $0x1b8] sm:$0xff]  }
   0xd   :  { %1621 = vmatpush3.bf16.msra.mxu1 %v1781_v11  ;;  %1600 = vmatprep.subr.bf16.mxu0 %v1782_v12  ;;  %v18_v32 = vld [vmem:[%s2357_s0] sm:$0xff]  ;;  %v19_v33 = vld [vmem:[%s2357_s0 + $0x8] sm:$0xff]  ;;  %v1810_v42 = vld [vmem:[%s2356_s1 + $0x170] sm:$0xff]  }
   0xe   :  { %1622 = vmatprep.subr.bf16.mxu1 %v1783_v13  ;;  %v1448_v34 = vcombine.low %v18_v32, %v18_v32  ;;  %v1449_v35 = vcombine.high %v18_v32, %v18_v32  ;;  %v1450_v36 = vcombine.low %v19_v33, %v19_v33  ;;  %v1451_v37 = vcombine.high %v19_v33, %v19_v33  ;;  %v1811_v43 = vld [vmem:[%s2356_s1 + $0x1f0] sm:$0xff]   ;;  %v1814_v46 = vld [vmem:[%s2356_s1 + $0x168] sm:$0xff]   ;;  %v1818_v50 = vld [vmem:[%s2356_s1 + $0x160] sm:$0xff]  }
   0xf   :  { %v1812_v44 = vld [vmem:[%s2356_s1 + $0x130] sm:$0xff]   ;;  %v1815_v47 = vld [vmem:[%s2356_s1 + $0x1e8] sm:$0xff]   ;;  %v1819_v51 = vld [vmem:[%s2356_s1 + $0x1e0] sm:$0xff]  }
  0x10   :  { %1601 = vmatpush3.bf16.msra.mxu0 %v1784_v14  ;;  %1138 = vmatprep.mubr.bf16.mxu0 %v1449_v35  ;;  %v1813_v45 = vld [vmem:[%s2356_s1 + $0x1b0] sm:$0xff]   ;;  %v1816_v48 = vld [vmem:[%s2356_s1 + $0x128] sm:$0xff]   ;;  %v1820_v52 = vld [vmem:[%s2356_s1 + $0x120] sm:$0xff]  }
  0x11   :  { %1623 = vmatpush3.bf16.msra.mxu1 %v1785_v15  ;;  %1602 = vmatprep.subr.bf16.mxu0 %v1786_v16  ;;  %v1817_v49 = vld [vmem:[%s2356_s1 + $0x1a8] sm:$0xff]   ;;  %v1821_v53 = vld [vmem:[%s2356_s1 + $0x1a0] sm:$0xff]   ;;  %v1822_v54 = vld [vmem:[%s2356_s1 + $0x158] sm:$0xff]  }
  0x12   :  { %1624 = vmatprep.subr.bf16.mxu1 %v1787_v17  ;;  %1178 = vmatprep.mubr.bf16.mxu1 %v1451_v37  ;;  %v1823_v55 = vld [vmem:[%s2356_s1 + $0x1d8] sm:$0xff]   ;;  %v1826_v58 = vld [vmem:[%s2356_s1 + $0x150] sm:$0xff]   ;;  %v1830_v62 = vld [vmem:[%s2356_s1 + $0x148] sm:$0xff]  }
  0x13   :  { %v1824_v56 = vld [vmem:[%s2356_s1 + $0x118] sm:$0xff]   ;;  %v1827_v59 = vld [vmem:[%s2356_s1 + $0x1d0] sm:$0xff]   ;;  %v1831_v63 = vld [vmem:[%s2356_s1 + $0x1c8] sm:$0xff]  }
  0x14   :  { %1603 = vmatpush3.bf16.msra.mxu0 %v1788_v18  ;;  %v1825_v57 = vld [vmem:[%s2356_s1 + $0x198] sm:$0xff]   ;;  %v1828_v60 = vld [vmem:[%s2356_s1 + $0x110] sm:$0xff]   ;;  %v1832_v0 = vld [vmem:[%s2356_s1 + $0x108] sm:$0xff]  }
  0x15   :  { %1625 = vmatpush3.bf16.msra.mxu1 %v1789_v19  ;;  %1604 = vmatprep.subr.bf16.mxu0 %v1790_v20  ;;  %v1829_v61 = vld [vmem:[%s2356_s1 + $0x190] sm:$0xff]   ;;  %v1833_v1 = vld [vmem:[%s2356_s1 + $0x188] sm:$0xff]   ;;  %v1834_v2 = vld [vmem:[%s2356_s1 + $0x140] sm:$0xff]  }
  0x16   :  { %1626 = vmatprep.subr.bf16.mxu1 %v1791_v21  ;;  %v1835_v3 = vld [vmem:[%s2356_s1 + $0x1c0] sm:$0xff]   ;;  %v20_v6 = vld [vmem:[%s2357_s0 + $0x10] sm:$0xff]  ;;  %v21_v9 = vld [vmem:[%s2357_s0 + $0x18] sm:$0xff] }
  0x17   :  { %v1836_v4 = vld [vmem:[%s2356_s1 + $0x100] sm:$0xff]   ;;  %v1452_v7 = vcombine.low %v20_v6, %v20_v6  ;;  %v1453_v8 = vcombine.high %v20_v6, %v20_v6  ;;  %v1454_v10 = vcombine.low %v21_v9, %v21_v9  ;;  %v1455_v11 = vcombine.high %v21_v9, %v21_v9  ;;  %v1842_v12 = vld [vmem:[%s2356_s1 + $0x278] sm:$0xff]   ;;  %v1846_v16 = vld [vmem:[%s2356_s1 + $0x270] sm:$0xff]  }
  0x18   :  { %1605 = vmatpush3.bf16.msra.mxu0 %v1792_v22  ;;  %v1837_v5 = vld [vmem:[%s2356_s1 + $0x180] sm:$0xff]   ;;  %v1843_v13 = vld [vmem:[%s2356_s1 + $0x2f8] sm:$0xff]   ;;  %v1847_v17 = vld [vmem:[%s2356_s1 + $0x2f0] sm:$0xff]  }
  0x19   :  { %1627 = vmatpush3.bf16.msra.mxu1 %v1793_v23  ;;  %1606 = vmatprep.subr.bf16.mxu0 %v1794_v24  ;;  %v1844_v14 = vld [vmem:[%s2356_s1 + $0x238] sm:$0xff]   ;;  %v1848_v18 = vld [vmem:[%s2356_s1 + $0x230] sm:$0xff]   ;;  %v1850_v20 = vld [vmem:[%s2356_s1 + $0x268] sm:$0xff]  }
  0x1a   :  { %1628 = vmatprep.subr.bf16.mxu1 %v1795_v25  ;;  %v1845_v15 = vld [vmem:[%s2356_s1 + $0x2b8] sm:$0xff]   ;;  %v1849_v19 = vld [vmem:[%s2356_s1 + $0x2b0] sm:$0xff]   ;;  %v1851_v21 = vld [vmem:[%s2356_s1 + $0x2e8] sm:$0xff]  }
  0x1b   :  { %v1852_v22 = vld [vmem:[%s2356_s1 + $0x228] sm:$0xff]   ;;  %v1854_v24 = vld [vmem:[%s2356_s1 + $0x260] sm:$0xff]   ;;  %v1862_v32 = vld [vmem:[%s2356_s1 + $0x250] sm:$0xff]  }
  0x1c   :  { %1607 = vmatpush3.bf16.msra.mxu0 %v1796_v26  ;;  %v1853_v23 = vld [vmem:[%s2356_s1 + $0x2a8] sm:$0xff]   ;;  %v1855_v25 = vld [vmem:[%s2356_s1 + $0x2e0] sm:$0xff]   ;;  %v1863_v33 = vld [vmem:[%s2356_s1 + $0x2d0] sm:$0xff]  }
  0x1d   :  { %1629 = vmatpush3.bf16.msra.mxu1 %v1797_v27  ;;  %1608 = vmatprep.subr.bf16.mxu0 %v1798_v28  ;;  %v1856_v26 = vld [vmem:[%s2356_s1 + $0x220] sm:$0xff]   ;;  %v1858_v28 = vld [vmem:[%s2356_s1 + $0x258] sm:$0xff]   ;;  %v1865_v35 = vld [vmem:[%s2356_s1 + $0x290] sm:$0xff]  }
  0x1e   :  { %1630 = vmatprep.subr.bf16.mxu1 %v1799_v29  ;;  %v1857_v27 = vld [vmem:[%s2356_s1 + $0x2a0] sm:$0xff]   ;;  %v1859_v29 = vld [vmem:[%s2356_s1 + $0x2d8] sm:$0xff]   ;;  %v1867_v37 = vld [vmem:[%s2356_s1 + $0x2c8] sm:$0xff]  }
  0x1f   :  { %v1898_v6 = vld [vmem:[%s2356_s1 + $0x350] sm:$0xff]  }
  0x20   :  { %1609 = vmatpush3.bf16.msra.mxu0 %v1800_v30  ;;  %v1860_v30 = vld [vmem:[%s2356_s1 + $0x218] sm:$0xff]   ;;  %v1901_v9 = vld [vmem:[%s2356_s1 + $0x390] sm:$0xff]  }
  0x21   :  { %1631 = vmatpush3.bf16.msra.mxu1 %v1801_v31  ;;  %1638 = vmatprep.subr.bf16.mxu0 %v1806_v38  ;;  %v1861_v31 = vld [vmem:[%s2356_s1 + $0x298] sm:$0xff]   ;;  %v1868_v38 = vld [vmem:[%s2356_s1 + $0x208] sm:$0xff]  }
  0x22   :  { %1660 = vmatprep.subr.bf16.mxu1 %v1807_v39  ;;  %v1869_v39 = vld [vmem:[%s2356_s1 + $0x288] sm:$0xff]  }
  0x23   :  { %1139 = vmatmul.mubr.bf16.vlgmr.msra.gmra.mxu0 %v1448_v34  ;;  %v1864_v34 = vld [vmem:[%s2356_s1 + $0x210] sm:$0xff]  }
  0x24   :  { %1179 = vmatmul.mubr.bf16.vlgmr.msra.gmra.mxu1 %v1450_v36  ;;  %1639 = vmatpush3.bf16.msra.mxu0 %v1808_v40  ;;  %v1866_v36 = vld [vmem:[%s2356_s1 + $0x248] sm:$0xff]   ;;  %v1870_v40 = vld [vmem:[%s2356_s1 + $0x240] sm:$0xff]  }
  0x25   :  { %1661 = vmatpush3.bf16.msra.mxu1 %v1809_v41  ;;  %1640 = vmatprep.subr.bf16.mxu0 %v1810_v42  ;;  %v1871_v41 = vld [vmem:[%s2356_s1 + $0x2c0] sm:$0xff]  }
  0x26   :  { %1662 = vmatprep.subr.bf16.mxu1 %v1811_v43  ;;  %1218 = vmatprep.mubr.bf16.mxu0 %v1453_v8  ;;  %v1872_v42 = vld [vmem:[%s2356_s1 + $0x200] sm:$0xff]   ;;  %v1900_v8 = vld [vmem:[%s2356_s1 + $0x310] sm:$0xff]  }
  0x27   :  { %1258 = vmatprep.mubr.bf16.mxu1 %v1455_v11  ;;  %v1873_v43 = vld [vmem:[%s2356_s1 + $0x280] sm:$0xff]   ;;  %v1903_v11 = vld [vmem:[%s2356_s1 + $0x3c8] sm:$0xff]  }
  0x28   :  { %1641 = vmatpush3.bf16.msra.mxu0 %v1812_v44  ;;  %v22_v44 = vld [vmem:[%s2357_s0 + $0x20] sm:$0xff] }
  0x29   :  { %1663 = vmatpush3.bf16.msra.mxu1 %v1813_v45  ;;  %1642 = vmatprep.subr.bf16.mxu0 %v1814_v46  ;;  %v23_v45 = vld [vmem:[%s2357_s0 + $0x28] sm:$0xff]  ;;  %v1456_v46 = vcombine.low %v22_v44, %v22_v44 }
  0x2a   :  { %1664 = vmatprep.subr.bf16.mxu1 %v1815_v47  ;;  %v1457_v47 = vcombine.high %v22_v44, %v22_v44 }
  0x2c   :  { %1643 = vmatpush3.bf16.msra.mxu0 %v1816_v48  ;;  %v1458_v48 = vcombine.low %v23_v45, %v23_v45 }
  0x2d   :  { %1665 = vmatpush3.bf16.msra.mxu1 %v1817_v49  ;;  %1644 = vmatprep.subr.bf16.mxu0 %v1818_v50  ;;  %v1459_v49 = vcombine.high %v23_v45, %v23_v45  ;;  %v1878_v50 = vld [vmem:[%s2356_s1 + $0x378] sm:$0xff]  }
  0x2e   :  { %1666 = vmatprep.subr.bf16.mxu1 %v1819_v51  ;;  %v1879_v51 = vld [vmem:[%s2356_s1 + $0x3f8] sm:$0xff]  }
  0x30   :  { %1645 = vmatpush3.bf16.msra.mxu0 %v1820_v52  ;;  %v1880_v52 = vld [vmem:[%s2356_s1 + $0x338] sm:$0xff]  }
  0x31   :  { %1667 = vmatpush3.bf16.msra.mxu1 %v1821_v53  ;;  %1646 = vmatprep.subr.bf16.mxu0 %v1822_v54  ;;  %v1881_v53 = vld [vmem:[%s2356_s1 + $0x3b8] sm:$0xff]   ;;  %v1882_v54 = vld [vmem:[%s2356_s1 + $0x370] sm:$0xff]  }
  0x32   :  { %1668 = vmatprep.subr.bf16.mxu1 %v1823_v55  ;;  %v1883_v55 = vld [vmem:[%s2356_s1 + $0x3f0] sm:$0xff]  }
  0x34   :  { %1647 = vmatpush3.bf16.msra.mxu0 %v1824_v56  ;;  %v1884_v56 = vld [vmem:[%s2356_s1 + $0x330] sm:$0xff]  }
  0x35   :  { %1669 = vmatpush3.bf16.msra.mxu1 %v1825_v57  ;;  %1648 = vmatprep.subr.bf16.mxu0 %v1826_v58  ;;  %v1885_v57 = vld [vmem:[%s2356_s1 + $0x3b0] sm:$0xff]   ;;  %v1886_v58 = vld [vmem:[%s2356_s1 + $0x368] sm:$0xff]  }
  0x36   :  { %1670 = vmatprep.subr.bf16.mxu1 %v1827_v59  ;;  %v1887_v59 = vld [vmem:[%s2356_s1 + $0x3e8] sm:$0xff]  }
  0x38   :  { %1649 = vmatpush3.bf16.msra.mxu0 %v1828_v60  ;;  %v1888_v60 = vld [vmem:[%s2356_s1 + $0x328] sm:$0xff]  }
  0x39   :  { %1671 = vmatpush3.bf16.msra.mxu1 %v1829_v61  ;;  %1650 = vmatprep.subr.bf16.mxu0 %v1830_v62  ;;  %v1889_v61 = vld [vmem:[%s2356_s1 + $0x3a8] sm:$0xff]   ;;  %v1890_v62 = vld [vmem:[%s2356_s1 + $0x360] sm:$0xff]  }
  0x3a   :  { %1672 = vmatprep.subr.bf16.mxu1 %v1831_v63  ;;  %v1891_v63 = vld [vmem:[%s2356_s1 + $0x3e0] sm:$0xff]  }
  0x3c   :  { %1651 = vmatpush3.bf16.msra.mxu0 %v1832_v0  ;;  %v1892_v0 = vld [vmem:[%s2356_s1 + $0x320] sm:$0xff]  }
  0x3d   :  { %1673 = vmatpush3.bf16.msra.mxu1 %v1833_v1  ;;  %1652 = vmatprep.subr.bf16.mxu0 %v1834_v2  ;;  %v1893_v1 = vld [vmem:[%s2356_s1 + $0x3a0] sm:$0xff]   ;;  %v1894_v2 = vld [vmem:[%s2356_s1 + $0x358] sm:$0xff]  }
  0x3e   :  { %1674 = vmatprep.subr.bf16.mxu1 %v1835_v3  ;;  %v1895_v3 = vld [vmem:[%s2356_s1 + $0x3d8] sm:$0xff]  }
  0x40   :  { %1653 = vmatpush3.bf16.msra.mxu0 %v1836_v4  ;;  %v1896_v4 = vld [vmem:[%s2356_s1 + $0x318] sm:$0xff]  }
  0x41   :  { %1675 = vmatpush3.bf16.msra.mxu1 %v1837_v5  ;;  %1682 = vmatprep.subr.bf16.mxu0 %v1842_v12  ;;  %v1897_v5 = vld [vmem:[%s2356_s1 + $0x398] sm:$0xff]   ;;  %v1904_v12 = vld [vmem:[%s2356_s1 + $0x308] sm:$0xff]  }
  0x42   :  { %1704 = vmatprep.subr.bf16.mxu1 %v1843_v13  ;;  %v1905_v13 = vld [vmem:[%s2356_s1 + $0x388] sm:$0xff]  }
  0x43   :  { %1219 = vmatmul.mubr.bf16.vlgmr.msra.gmra.mxu0 %v1452_v7  ;;  %v1899_v7 = vld [vmem:[%s2356_s1 + $0x3d0] sm:$0xff]  }
  0x44   :  { %1259 = vmatmul.mubr.bf16.vlgmr.msra.gmra.mxu1 %v1454_v10  ;;  %1683 = vmatpush3.bf16.msra.mxu0 %v1844_v14  ;;  %v1902_v10 = vld [vmem:[%s2356_s1 + $0x348] sm:$0xff]   ;;  %v1906_v14 = vld [vmem:[%s2356_s1 + $0x340] sm:$0xff]  }
  0x45   :  { %1705 = vmatpush3.bf16.msra.mxu1 %v1845_v15  ;;  %1684 = vmatprep.subr.bf16.mxu0 %v1846_v16  ;;  %v1907_v15 = vld [vmem:[%s2356_s1 + $0x3c0] sm:$0xff]  }
  0x46   :  { %1706 = vmatprep.subr.bf16.mxu1 %v1847_v17  ;;  %1298 = vmatprep.mubr.bf16.mxu0 %v1457_v47  ;;  %v1908_v16 = vld [vmem:[%s2356_s1 + $0x300] sm:$0xff]  }
  0x47   :  { %1338 = vmatprep.mubr.bf16.mxu1 %v1459_v49  ;;  %v1909_v17 = vld [vmem:[%s2356_s1 + $0x380] sm:$0xff]  }
  0x48   :  { %1685 = vmatpush3.bf16.msra.mxu0 %v1848_v18  ;;  %v24_v18 = vld [vmem:[%s2357_s0 + $0x30] sm:$0xff] }
  0x49   :  { %1707 = vmatpush3.bf16.msra.mxu1 %v1849_v19  ;;  %1686 = vmatprep.subr.bf16.mxu0 %v1850_v20  ;;  %v25_v19 = vld [vmem:[%s2357_s0 + $0x38] sm:$0xff]  ;;  %v1460_v20 = vcombine.low %v24_v18, %v24_v18 }
  0x4a   :  { %1708 = vmatprep.subr.bf16.mxu1 %v1851_v21  ;;  %v1461_v21 = vcombine.high %v24_v18, %v24_v18 }
  0x4c   :  { %1687 = vmatpush3.bf16.msra.mxu0 %v1852_v22  ;;  %v1462_v22 = vcombine.low %v25_v19, %v25_v19 }
  0x4d   :  { %1709 = vmatpush3.bf16.msra.mxu1 %v1853_v23  ;;  %1688 = vmatprep.subr.bf16.mxu0 %v1854_v24  ;;  %v1463_v23 = vcombine.high %v25_v19, %v25_v19 }
  0x4e   :  { %1710 = vmatprep.subr.bf16.mxu1 %v1855_v25 }
  0x50   :  { %1689 = vmatpush3.bf16.msra.mxu0 %v1856_v26 }
  0x51   :  { %1711 = vmatpush3.bf16.msra.mxu1 %v1857_v27  ;;  %1690 = vmatprep.subr.bf16.mxu0 %v1858_v28 }
  0x52   :  { %1712 = vmatprep.subr.bf16.mxu1 %v1859_v29 }
  0x54   :  { %1691 = vmatpush3.bf16.msra.mxu0 %v1860_v30 }
  0x55   :  { %1713 = vmatpush3.bf16.msra.mxu1 %v1861_v31  ;;  %1692 = vmatprep.subr.bf16.mxu0 %v1862_v32 }
  0x56   :  { %1714 = vmatprep.subr.bf16.mxu1 %v1863_v33 }
  0x58   :  { %1693 = vmatpush3.bf16.msra.mxu0 %v1864_v34 }
  0x59   :  { %1715 = vmatpush3.bf16.msra.mxu1 %v1865_v35  ;;  %1694 = vmatprep.subr.bf16.mxu0 %v1866_v36 }
  0x5a   :  { %1716 = vmatprep.subr.bf16.mxu1 %v1867_v37 }
  0x5c   :  { %1695 = vmatpush3.bf16.msra.mxu0 %v1868_v38 }
  0x5d   :  { %1717 = vmatpush3.bf16.msra.mxu1 %v1869_v39  ;;  %1696 = vmatprep.subr.bf16.mxu0 %v1870_v40 }
  0x5e   :  { %1718 = vmatprep.subr.bf16.mxu1 %v1871_v41 }
  0x60   :  { %1697 = vmatpush3.bf16.msra.mxu0 %v1872_v42 }
  0x61   :  { %1719 = vmatpush3.bf16.msra.mxu1 %v1873_v43  ;;  %1726 = vmatprep.subr.bf16.mxu0 %v1878_v50 }
  0x62   :  { %1748 = vmatprep.subr.bf16.mxu1 %v1879_v51 }
  0x63   :  { %1299 = vmatmul.mubr.bf16.vlgmr.msra.gmra.mxu0 %v1456_v46 }
  0x64   :  { %1339 = vmatmul.mubr.bf16.vlgmr.msra.gmra.mxu1 %v1458_v48  ;;  %1727 = vmatpush3.bf16.msra.mxu0 %v1880_v52 }
  0x65   :  { %1749 = vmatpush3.bf16.msra.mxu1 %v1881_v53  ;;  %1728 = vmatprep.subr.bf16.mxu0 %v1882_v54 }
  0x66   :  { %1750 = vmatprep.subr.bf16.mxu1 %v1883_v55  ;;  %1378 = vmatprep.mubr.bf16.mxu0 %v1461_v21 }
  0x67   :  { %1418 = vmatprep.mubr.bf16.mxu1 %v1463_v23 }
  0x68   :  { %1729 = vmatpush3.bf16.msra.mxu0 %v1884_v56 }
  0x69   :  { %1751 = vmatpush3.bf16.msra.mxu1 %v1885_v57  ;;  %1730 = vmatprep.subr.bf16.mxu0 %v1886_v58 }
  0x6a   :  { %1752 = vmatprep.subr.bf16.mxu1 %v1887_v59 }
  0x6c   :  { %1731 = vmatpush3.bf16.msra.mxu0 %v1888_v60 }
  0x6d   :  { %1753 = vmatpush3.bf16.msra.mxu1 %v1889_v61  ;;  %1732 = vmatprep.subr.bf16.mxu0 %v1890_v62 }
  0x6e   :  { %1754 = vmatprep.subr.bf16.mxu1 %v1891_v63 }
  0x70   :  { %1733 = vmatpush3.bf16.msra.mxu0 %v1892_v0 }
  0x71   :  { %1755 = vmatpush3.bf16.msra.mxu1 %v1893_v1  ;;  %1734 = vmatprep.subr.bf16.mxu0 %v1894_v2 }
  0x72   :  { %1756 = vmatprep.subr.bf16.mxu1 %v1895_v3 }
  0x74   :  { %1735 = vmatpush3.bf16.msra.mxu0 %v1896_v4  ;;  %v1592_v4 = vld [vmem:[%s2358_s2] ss:$0 sm:$0xff] }
  0x75   :  { %1757 = vmatpush3.bf16.msra.mxu1 %v1897_v5  ;;  %1736 = vmatprep.subr.bf16.mxu0 %v1898_v6 }
  0x76   :  { %1758 = vmatprep.subr.bf16.mxu1 %v1899_v7 }
  0x78   :  { %1737 = vmatpush3.bf16.msra.mxu0 %v1900_v8  ;;  %v1593_v8 = vld [vmem:[%s2359_s3] ss:$0 sm:$0xff] }
  0x79   :  { %1759 = vmatpush3.bf16.msra.mxu1 %v1901_v9  ;;  %1738 = vmatprep.subr.bf16.mxu0 %v1902_v10 }
  0x7a   :  { %1760 = vmatprep.subr.bf16.mxu1 %v1903_v11 }
  0x7c   :  { %1739 = vmatpush3.bf16.msra.mxu0 %v1904_v12 }
  0x7d   :  { %1761 = vmatpush3.bf16.msra.mxu1 %v1905_v13  ;;  %1740 = vmatprep.subr.bf16.mxu0 %v1906_v14 }
  0x7e   :  { %1762 = vmatprep.subr.bf16.mxu1 %v1907_v15 }
  0x80   :  { %1741 = vmatpush3.bf16.msra.mxu0 %v1908_v16 }
  0x81   :  { %1763 = vmatpush3.bf16.msra.mxu1 %v1909_v17 }
  0x83   :  { %1379 = vmatmul.mubr.bf16.vlgmr.msra.gmra.mxu0 %v1460_v20 }
  0x84   :  { %1419 = vmatmul.mubr.bf16.vlgmr.msra.gmra.mxu1 %v1462_v22 }
  0xe3   :  { %v1610_v24 = vpop.f32.mrf.mxu0 }
  0xe4   :  { %v1632_v25 = vpop.f32.mrf.mxu1 }
  0xe5   :  { %v1611_v26 = vpop.f32.mrf.mxu0 }
  0xe6   :  { %v1633_v27 = vpop.f32.mrf.mxu1  ;;  %v1612_v28 = vadd.f32 %v1611_v26, %v1610_v24 }
  0xe7   :  { %v1634_v29 = vadd.f32 %v1633_v27, %v1632_v25  ;;  %v1613_v30 = vpop.f32.mrf.mxu0 }
  0xe8   :  { %v1635_v31 = vpop.f32.mrf.mxu1 }
  0xe9   :  { %v1181_v32 = vadd.f32 %v1634_v29, %v1612_v28  ;;  %v1614_v33 = vpop.f32.mrf.mxu0 }
  0xea   :  { %v1636_v34 = vpop.f32.mrf.mxu1 }
 0x103   :  { %v1654_v35 = vpop.f32.mrf.mxu0 }
 0x104   :  { %v1676_v36 = vpop.f32.mrf.mxu1 }
 0x105   :  { %v1655_v37 = vpop.f32.mrf.mxu0 }
 0x106   :  { %v1677_v38 = vpop.f32.mrf.mxu1  ;;  %v1656_v51 = vadd.f32 %v1655_v37, %v1654_v35 }
 0x107   :  { %v1657_v39 = vpop.f32.mrf.mxu0  ;;  %v1678_v53 = vadd.f32 %v1677_v38, %v1676_v36 }
 0x108   :  { %v1679_v40 = vpop.f32.mrf.mxu1  ;;  %v1221_v52 = vadd.f32 %v1656_v51, %v1181_v32 }
 0x109   :  { %v1658_v41 = vpop.f32.mrf.mxu0 }
 0x10a   :  { %v1680_v42 = vpop.f32.mrf.mxu1  ;;  %v1261_v55 = vadd.f32 %v1678_v53, %v1221_v52 }
 0x123   :  { %v1698_v43 = vpop.f32.mrf.mxu0 }
 0x124   :  { %v1720_v44 = vpop.f32.mrf.mxu1 }
 0x125   :  { %v1699_v45 = vpop.f32.mrf.mxu0 }
 0x126   :  { %v1721_v46 = vpop.f32.mrf.mxu1  ;;  %v1700_v54 = vadd.f32 %v1699_v45, %v1698_v43 }
 0x127   :  { %v1701_v47 = vpop.f32.mrf.mxu0  ;;  %v1722_v57 = vadd.f32 %v1721_v46, %v1720_v44 }
 0x128   :  { %v1723_v48 = vpop.f32.mrf.mxu1  ;;  %v1301_v56 = vadd.f32 %v1700_v54, %v1261_v55 }
 0x129   :  { %v1702_v49 = vpop.f32.mrf.mxu0 }
 0x12a   :  { %v1724_v50 = vpop.f32.mrf.mxu1  ;;  %v1341_v61 = vadd.f32 %v1722_v57, %v1301_v56 }
 0x143   :  { %v1742_v58 = vpop.f32.mrf.mxu0 }
 0x144   :  { %v1764_v59 = vpop.f32.mrf.mxu1 }
 0x145   :  { %v1743_v60 = vpop.f32.mrf.mxu0 }
 0x146   :  { %v1744_v62 = vadd.f32 %v1743_v60, %v1742_v58  ;;  %v1765_v63 = vpop.f32.mrf.mxu1 }
 0x147   :  { %v1745_v0 = vpop.f32.mrf.mxu0  ;;  %v1766_v2 = vadd.f32 %v1765_v63, %v1764_v59 }
 0x148   :  { %v1381_v1 = vadd.f32 %v1744_v62, %v1341_v61  ;;  %v1767_v3 = vpop.f32.mrf.mxu1 }
 0x149   :  { %v1746_v5 = vpop.f32.mrf.mxu0 }
 0x14a   :  { %v1421_v6 = vadd.f32 %v1766_v2, %v1381_v1  ;;  %v1768_v7 = vpop.f32.mrf.mxu1 }
 0x14c   :  { %v1433_v9 = vmul.f32 %v1592_v4, %v1421_v6 }
 0x14e   :  { %v1441_v10 = vadd.f32 %v1593_v8, %v1433_v9 }
 0x150   :  { %1443 = vst.msk [vmem:[%s2360_s4] sm:$0xff] %vm1442_vm0, %v1441_v10 }

</bundles_post_ra>
